<compile_context>
chip_gen: v6e
topology: v6e:2x2x1
jax: 0.10.0
libtpu: 0.0.40
codegen_flags: <defaults>
</compile_context>

<pallas_src>
import numpy as np
import jax
import jax.numpy as jnp
from jax.experimental import pallas as pl
from jax.experimental.pallas import tpu as pltpu  # noqa: F401  (TPU backend assumed)

# ---------------- small demo configuration (consistent with the module) ----------------
STATE_DIM = 3
DICTIONARY_DIM = 12
INPUTS_DIM = 2
U_DICTIONARY_DIM = 5
PARAMS_DIM = 3
HIDDEN = 32
NUM_RES_BLOCKS = 2           # "layers" of the synthesized FC ResNet trunks
BATCH = 4

KOOPMAN_DIM = DICTIONARY_DIM + STATE_DIM + 1       # 16
U_DIM = U_DICTIONARY_DIM + INPUTS_DIM + 1          # 8
NUM_BLOCKS = KOOPMAN_DIM // 2                      # 8


# ---------------- helpers ----------------
def _full_spec(shape):
    """Whole-array VMEM block (index_map tolerates any grid arity, incl. empty grid)."""
    nd = len(shape)
    return pl.BlockSpec(shape, lambda *_: (0,) * nd)


def _flatten_trunk(w):
    flat = [w["w_in"], w["b_in"]]
    for blk in w["blocks"]:
        flat += [blk["w1"], blk["b1"], blk["w2"], blk["b2"]]
    flat += [w["w_out"], w["b_out"]]
    return flat


def _make_constants(sample_step):
    """Constant matrices/masks used by the fused kernel (built once in numpy)."""
    Kd, nb, Ud = KOOPMAN_DIM, NUM_BLOCKS, U_DIM
    lane = np.arange(Kd)
    valid = (lane < 2 * nb).astype(np.float32)[None, :]                      # zero tail cols of K
    sgn = np.where(lane % 2 == 0, 1.0, -1.0).astype(np.float32)[None, :] * valid
    # angle duplication (nb -> 2*nb lanes), sample_step folded in
    D = np.zeros((nb, Kd), np.float32)
    D[np.arange(nb), 2 * np.arange(nb)] = float(sample_step)
    D[np.arange(nb), 2 * np.arange(nb) + 1] = float(sample_step)
    # pairwise lane swap: (x @ P)[2k] = x[2k+1], (x @ P)[2k+1] = x[2k]
    P = np.zeros((Kd, Kd), np.float32)
    P[2 * np.arange(nb) + 1, 2 * np.arange(nb)] = 1.0
    P[2 * np.arange(nb), 2 * np.arange(nb) + 1] = 1.0
    # inputs @ B via expand / elementwise / group-reduce (all on MXU + one VPU mul)
    E = np.zeros((Ud, Ud * Kd), np.float32)                                   # u -> u broadcast per block
    for u in range(Ud):
        E[u, u * Kd:(u + 1) * Kd] = 1.0
    R = np.zeros((Ud * Kd, Kd), np.float32)                                   # lane-group sum
    for u in range(Ud):
        R[u * Kd:(u + 1) * Kd, :] = np.eye(Kd, dtype=np.float32)
    return D, P, sgn, valid, E, R


# ---------------- in-kernel FC ResNet trunk (statically unrolled) ----------------
def _trunk_eval(p, wr):
    """wr: refs in _flatten_trunk order. Returns the trunk output as an in-kernel value."""
    def lin(x, w_ref, b_ref, act, res=None):
        y = jnp.dot(x, w_ref[...], preferred_element_type=jnp.float32) + b_ref[...]
        if res is not None:
            y = y + res
        return jnp.maximum(y, 0.0) if act else y

    h = lin(p, wr[0], wr[1], True)
    i = 2
    for _ in range(NUM_RES_BLOCKS):
        h1 = lin(h, wr[i], wr[i + 1], True)
        h = lin(h1, wr[i + 2], wr[i + 3], True, res=h)
        i += 4
    return lin(h, wr[i], wr[i + 1], False)


# ---------------- fused forward kernel ----------------
def _build_fused_kernel(n_lam, n_b):
    def kernel(*refs):
        x_ref, u_ref, p_ref = refs[0], refs[1], refs[2]
        off = 3
        lam_refs = refs[off:off + n_lam]; off += n_lam
        b_refs = refs[off:off + n_b]; off += n_b
        d_ref, pswap_ref, sgn_ref, valid_ref, e_ref, r_ref = refs[off:off + 6]
        o_ref = refs[off + 6]

        params = p_ref[...]
        angles = _trunk_eval(params, lam_refs)            # (B, nb)
        b_flat = _trunk_eval(params, b_refs)              # (B, Ud*Kd), row-major (u, k)

        # x_dic @ K  (block-diagonal 2x2 rotations)
        angf = jnp.dot(angles, d_ref[...], preferred_element_type=jnp.float32)   # (B, Kd)
        cosf = jnp.cos(angf) * valid_ref[...]
        sinf = jnp.sin(angf) * sgn_ref[...]
        x = x_ref[...]
        x_swap = jnp.dot(x, pswap_ref[...], preferred_element_type=jnp.float32)
        rot = x * cosf + x_swap * sinf

        # inputs_dic @ B  (expand -> elementwise -> group-reduce, both small MXU matmuls)
        u = u_ref[...]
        u_exp = jnp.dot(u, e_ref[...], preferred_element_type=jnp.float32)       # (B, Ud*Kd)
        uB = jnp.dot(u_exp * b_flat, r_ref[...], preferred_element_type=jnp.float32)  # (B, Kd)

        o_ref[...] = rot + uB
    return kernel


def param_orthogonal_koopman_forward(x_dic, inputs_dic, params, weights, sample_step=1.0):
    lam_flat = _flatten_trunk(weights["lambda"])
    bmat_flat = _flatten_trunk(weights["B"])
    consts = [jnp.asarray(c) for c in _make_constants(sample_step)]
    args = [x_dic, inputs_dic, params] + lam_flat + bmat_flat + consts
    Bn = x_dic.shape[0]

    kernel = _build_fused_kernel(len(lam_flat), len(bmat_flat))
    return pl.pallas_call(
        kernel,
        out_shape=jax.ShapeDtypeStruct((Bn, KOOPMAN_DIM), jnp.float32),
        in_specs=[_full_spec(tuple(a.shape)) for a in args],
        out_specs=_full_spec((Bn, KOOPMAN_DIM)),
    )(*args)


# ---------------- pure-JAX reference with the exact PyTorch semantics ----------------
def _linear_ref(x, w, b, *, act=False, residual=None):
    y = x @ w + b
    if residual is not None:
        y = y + residual
    return jnp.maximum(y, 0.0) if act else y


def _resnet_ref(w, x):
    h = _linear_ref(x, w["w_in"], w["b_in"], act=True)
    for blk in w["blocks"]:
        h1 = _linear_ref(h, blk["w1"], blk["b1"], act=True)
        h = _linear_ref(h1, blk["w2"], blk["b2"], act=True, residual=h)
    return _linear_ref(h, w["w_out"], w["b_out"], act=False)


def reference_forward(x_dic, inputs_dic, params, weights, sample_step=1.0):
    angles = _resnet_ref(weights["lambda"], params) * sample_step
    b_flat = _resnet_ref(weights["B"], params)
    bmat = b_flat.reshape(-1, U_DIM, KOOPMAN_DIM)
    cos_v = jnp.cos(angles)
    sin_v = jnp.sin(angles)
    Bn = x_dic.shape[0]
    K = jnp.zeros((Bn, KOOPMAN_DIM, KOOPMAN_DIM), jnp.float32)
    i_idx = 2 * jnp.arange(NUM_BLOCKS)
    j_idx = i_idx + 1
    K = K.at[:, i_idx, i_idx].set(cos_v)
    K = K.at[:, i_idx, j_idx].set(-sin_v)
    K = K.at[:, j_idx, i_idx].set(sin_v)
    K = K.at[:, j_idx, j_idx].set(cos_v)
    xK = jnp.einsum('bi,bij->bj', x_dic, K)
    uB = jnp.einsum('bi,bij->bj', inputs_dic, bmat)
    return xK + uB


# ---------------- deterministic weight init for the synthesized trunks ----------------
def init_resnet_weights(key, in_dim, hidden, out_dim, num_blocks):
    def lin(k, i, o):
        kw, kb = jax.random.split(k)
        scale = 1.0 / np.sqrt(i)
        return (jax.random.uniform(kw, (i, o), jnp.float32, -scale, scale),
                jax.random.uniform(kb, (1, o), jnp.float32, -scale, scale))

    keys = jax.random.split(key, 2 * num_blocks + 2)
    w_in, b_in = lin(keys[0], in_dim, hidden)
    blocks = []
    for bidx in range(num_blocks):
        w1, b1 = lin(keys[1 + 2 * bidx], hidden, hidden)
        w2, b2 = lin(keys[2 + 2 * bidx], hidden, hidden)
        blocks.append(dict(w1=w1, b1=b1, w2=w2, b2=b2))
    w_out, b_out = lin(keys[-1], hidden, out_dim)
    return dict(w_in=w_in, b_in=b_in, blocks=blocks, w_out=w_out, b_out=b_out)


if __name__ == "__main__":
    key = jax.random.PRNGKey(0)
    k1, k2, k3, kw1, kw2 = jax.random.split(key, 5)

    x_dic = jax.random.normal(k1, (BATCH, KOOPMAN_DIM), jnp.float32)
    inputs_dic = jax.random.normal(k2, (BATCH, U_DIM), jnp.float32)
    params = jax.random.normal(k3, (BATCH, PARAMS_DIM), jnp.float32)

    weights = {
        "lambda": init_resnet_weights(kw1, PARAMS_DIM, HIDDEN, NUM_BLOCKS, NUM_RES_BLOCKS),
        "B": init_resnet_weights(kw2, PARAMS_DIM, HIDDEN, U_DIM * KOOPMAN_DIM, NUM_RES_BLOCKS),
    }

    out = param_orthogonal_koopman_forward(x_dic, inputs_dic, params, weights, sample_step=1.0)
    out = jax.block_until_ready(out)

    ref = reference_forward(x_dic, inputs_dic, params, weights, sample_step=1.0)
    np.testing.assert_allclose(np.asarray(out), np.asarray(ref), rtol=1e-3, atol=1e-3)

    print("KERNEL_OK")
</pallas_src>

<mosaic_0001>
module attributes {stable_mosaic.version = 11 : i64} {
  func.func @kernel(%arg0: memref<4x16xf32, #tpu.memory_space<vmem>>, %arg1: memref<4x8xf32, #tpu.memory_space<vmem>>, %arg2: memref<4x3xf32, #tpu.memory_space<vmem>>, %arg3: memref<3x32xf32, #tpu.memory_space<vmem>>, %arg4: memref<1x32xf32, #tpu.memory_space<vmem>>, %arg5: memref<32x32xf32, #tpu.memory_space<vmem>>, %arg6: memref<1x32xf32, #tpu.memory_space<vmem>>, %arg7: memref<32x32xf32, #tpu.memory_space<vmem>>, %arg8: memref<1x32xf32, #tpu.memory_space<vmem>>, %arg9: memref<32x32xf32, #tpu.memory_space<vmem>>, %arg10: memref<1x32xf32, #tpu.memory_space<vmem>>, %arg11: memref<32x32xf32, #tpu.memory_space<vmem>>, %arg12: memref<1x32xf32, #tpu.memory_space<vmem>>, %arg13: memref<32x8xf32, #tpu.memory_space<vmem>>, %arg14: memref<1x8xf32, #tpu.memory_space<vmem>>, %arg15: memref<3x32xf32, #tpu.memory_space<vmem>>, %arg16: memref<1x32xf32, #tpu.memory_space<vmem>>, %arg17: memref<32x32xf32, #tpu.memory_space<vmem>>, %arg18: memref<1x32xf32, #tpu.memory_space<vmem>>, %arg19: memref<32x32xf32, #tpu.memory_space<vmem>>, %arg20: memref<1x32xf32, #tpu.memory_space<vmem>>, %arg21: memref<32x32xf32, #tpu.memory_space<vmem>>, %arg22: memref<1x32xf32, #tpu.memory_space<vmem>>, %arg23: memref<32x32xf32, #tpu.memory_space<vmem>>, %arg24: memref<1x32xf32, #tpu.memory_space<vmem>>, %arg25: memref<32x128xf32, #tpu.memory_space<vmem>>, %arg26: memref<1x128xf32, #tpu.memory_space<vmem>>, %arg27: memref<8x16xf32, #tpu.memory_space<vmem>>, %arg28: memref<16x16xf32, #tpu.memory_space<vmem>>, %arg29: memref<1x16xf32, #tpu.memory_space<vmem>>, %arg30: memref<1x16xf32, #tpu.memory_space<vmem>>, %arg31: memref<8x128xf32, #tpu.memory_space<vmem>>, %arg32: memref<128x16xf32, #tpu.memory_space<vmem>>, %arg33: memref<4x16xf32, #tpu.memory_space<vmem>>) attributes {dimension_semantics = [], scalar_prefetch = 0 : i64, scratch_operands = 0 : i64, tpu.core_type = #tpu.core_type<tc>} {
    %c0 = arith.constant 0 : index
    %c0_0 = arith.constant 0 : index
    %0 = vector.load %arg2[%c0, %c0_0] : memref<4x3xf32, #tpu.memory_space<vmem>>, vector<4x3xf32>
    %c0_1 = arith.constant 0 : index
    %c0_2 = arith.constant 0 : index
    %1 = vector.load %arg3[%c0_1, %c0_2] : memref<3x32xf32, #tpu.memory_space<vmem>>, vector<3x32xf32>
    %cst = arith.constant dense<0.000000e+00> : vector<4x32xf32>
    %2 = tpu.matmul %0, %1, %cst {dimension_numbers = #tpu.dot_dimension_numbers<[1], [0], [0], [1], [0, 0, 1, 1], [], []>} : vector<4x3xf32>, vector<3x32xf32>, vector<4x32xf32> -> vector<4x32xf32>
    %c0_3 = arith.constant 0 : index
    %c0_4 = arith.constant 0 : index
    %3 = vector.load %arg4[%c0_3, %c0_4] : memref<1x32xf32, #tpu.memory_space<vmem>>, vector<1x32xf32>
    %4 = vector.broadcast %3 : vector<1x32xf32> to vector<4x32xf32>
    %5 = arith.addf %2, %4 : vector<4x32xf32>
    %cst_5 = arith.constant 0.000000e+00 : f32
    %6 = vector.broadcast %cst_5 : f32 to vector<4x32xf32>
    %7 = arith.maximumf %5, %6 : vector<4x32xf32>
    %c0_6 = arith.constant 0 : index
    %c0_7 = arith.constant 0 : index
    %8 = vector.load %arg5[%c0_6, %c0_7] : memref<32x32xf32, #tpu.memory_space<vmem>>, vector<32x32xf32>
    %cst_8 = arith.constant dense<0.000000e+00> : vector<4x32xf32>
    %9 = tpu.matmul %7, %8, %cst_8 {dimension_numbers = #tpu.dot_dimension_numbers<[1], [0], [0], [1], [0, 0, 1, 1], [], []>} : vector<4x32xf32>, vector<32x32xf32>, vector<4x32xf32> -> vector<4x32xf32>
    %c0_9 = arith.constant 0 : index
    %c0_10 = arith.constant 0 : index
    %10 = vector.load %arg6[%c0_9, %c0_10] : memref<1x32xf32, #tpu.memory_space<vmem>>, vector<1x32xf32>
    %11 = vector.broadcast %10 : vector<1x32xf32> to vector<4x32xf32>
    %12 = arith.addf %9, %11 : vector<4x32xf32>
    %cst_11 = arith.constant 0.000000e+00 : f32
    %13 = vector.broadcast %cst_11 : f32 to vector<4x32xf32>
    %14 = arith.maximumf %12, %13 : vector<4x32xf32>
    %c0_12 = arith.constant 0 : index
    %c0_13 = arith.constant 0 : index
    %15 = vector.load %arg7[%c0_12, %c0_13] : memref<32x32xf32, #tpu.memory_space<vmem>>, vector<32x32xf32>
    %cst_14 = arith.constant dense<0.000000e+00> : vector<4x32xf32>
    %16 = tpu.matmul %14, %15, %cst_14 {dimension_numbers = #tpu.dot_dimension_numbers<[1], [0], [0], [1], [0, 0, 1, 1], [], []>} : vector<4x32xf32>, vector<32x32xf32>, vector<4x32xf32> -> vector<4x32xf32>
    %c0_15 = arith.constant 0 : index
    %c0_16 = arith.constant 0 : index
    %17 = vector.load %arg8[%c0_15, %c0_16] : memref<1x32xf32, #tpu.memory_space<vmem>>, vector<1x32xf32>
    %18 = vector.broadcast %17 : vector<1x32xf32> to vector<4x32xf32>
    %19 = arith.addf %16, %18 : vector<4x32xf32>
    %20 = arith.addf %19, %7 : vector<4x32xf32>
    %cst_17 = arith.constant 0.000000e+00 : f32
    %21 = vector.broadcast %cst_17 : f32 to vector<4x32xf32>
    %22 = arith.maximumf %20, %21 : vector<4x32xf32>
    %c0_18 = arith.constant 0 : index
    %c0_19 = arith.constant 0 : index
    %23 = vector.load %arg9[%c0_18, %c0_19] : memref<32x32xf32, #tpu.memory_space<vmem>>, vector<32x32xf32>
    %cst_20 = arith.constant dense<0.000000e+00> : vector<4x32xf32>
    %24 = tpu.matmul %22, %23, %cst_20 {dimension_numbers = #tpu.dot_dimension_numbers<[1], [0], [0], [1], [0, 0, 1, 1], [], []>} : vector<4x32xf32>, vector<32x32xf32>, vector<4x32xf32> -> vector<4x32xf32>
    %c0_21 = arith.constant 0 : index
    %c0_22 = arith.constant 0 : index
    %25 = vector.load %arg10[%c0_21, %c0_22] : memref<1x32xf32, #tpu.memory_space<vmem>>, vector<1x32xf32>
    %26 = vector.broadcast %25 : vector<1x32xf32> to vector<4x32xf32>
    %27 = arith.addf %24, %26 : vector<4x32xf32>
    %cst_23 = arith.constant 0.000000e+00 : f32
    %28 = vector.broadcast %cst_23 : f32 to vector<4x32xf32>
    %29 = arith.maximumf %27, %28 : vector<4x32xf32>
    %c0_24 = arith.constant 0 : index
    %c0_25 = arith.constant 0 : index
    %30 = vector.load %arg11[%c0_24, %c0_25] : memref<32x32xf32, #tpu.memory_space<vmem>>, vector<32x32xf32>
    %cst_26 = arith.constant dense<0.000000e+00> : vector<4x32xf32>
    %31 = tpu.matmul %29, %30, %cst_26 {dimension_numbers = #tpu.dot_dimension_numbers<[1], [0], [0], [1], [0, 0, 1, 1], [], []>} : vector<4x32xf32>, vector<32x32xf32>, vector<4x32xf32> -> vector<4x32xf32>
    %c0_27 = arith.constant 0 : index
    %c0_28 = arith.constant 0 : index
    %32 = vector.load %arg12[%c0_27, %c0_28] : memref<1x32xf32, #tpu.memory_space<vmem>>, vector<1x32xf32>
    %33 = vector.broadcast %32 : vector<1x32xf32> to vector<4x32xf32>
    %34 = arith.addf %31, %33 : vector<4x32xf32>
    %35 = arith.addf %34, %22 : vector<4x32xf32>
    %cst_29 = arith.constant 0.000000e+00 : f32
    %36 = vector.broadcast %cst_29 : f32 to vector<4x32xf32>
    %37 = arith.maximumf %35, %36 : vector<4x32xf32>
    %c0_30 = arith.constant 0 : index
    %c0_31 = arith.constant 0 : index
    %38 = vector.load %arg13[%c0_30, %c0_31] : memref<32x8xf32, #tpu.memory_space<vmem>>, vector<32x8xf32>
    %cst_32 = arith.constant dense<0.000000e+00> : vector<4x8xf32>
    %39 = tpu.matmul %37, %38, %cst_32 {dimension_numbers = #tpu.dot_dimension_numbers<[1], [0], [0], [1], [0, 0, 1, 1], [], []>} : vector<4x32xf32>, vector<32x8xf32>, vector<4x8xf32> -> vector<4x8xf32>
    %c0_33 = arith.constant 0 : index
    %c0_34 = arith.constant 0 : index
    %40 = vector.load %arg14[%c0_33, %c0_34] : memref<1x8xf32, #tpu.memory_space<vmem>>, vector<1x8xf32>
    %41 = vector.broadcast %40 : vector<1x8xf32> to vector<4x8xf32>
    %42 = arith.addf %39, %41 : vector<4x8xf32>
    %c0_35 = arith.constant 0 : index
    %c0_36 = arith.constant 0 : index
    %43 = vector.load %arg15[%c0_35, %c0_36] : memref<3x32xf32, #tpu.memory_space<vmem>>, vector<3x32xf32>
    %cst_37 = arith.constant dense<0.000000e+00> : vector<4x32xf32>
    %44 = tpu.matmul %0, %43, %cst_37 {dimension_numbers = #tpu.dot_dimension_numbers<[1], [0], [0], [1], [0, 0, 1, 1], [], []>} : vector<4x3xf32>, vector<3x32xf32>, vector<4x32xf32> -> vector<4x32xf32>
    %c0_38 = arith.constant 0 : index
    %c0_39 = arith.constant 0 : index
    %45 = vector.load %arg16[%c0_38, %c0_39] : memref<1x32xf32, #tpu.memory_space<vmem>>, vector<1x32xf32>
    %46 = vector.broadcast %45 : vector<1x32xf32> to vector<4x32xf32>
    %47 = arith.addf %44, %46 : vector<4x32xf32>
    %cst_40 = arith.constant 0.000000e+00 : f32
    %48 = vector.broadcast %cst_40 : f32 to vector<4x32xf32>
    %49 = arith.maximumf %47, %48 : vector<4x32xf32>
    %c0_41 = arith.constant 0 : index
    %c0_42 = arith.constant 0 : index
    %50 = vector.load %arg17[%c0_41, %c0_42] : memref<32x32xf32, #tpu.memory_space<vmem>>, vector<32x32xf32>
    %cst_43 = arith.constant dense<0.000000e+00> : vector<4x32xf32>
    %51 = tpu.matmul %49, %50, %cst_43 {dimension_numbers = #tpu.dot_dimension_numbers<[1], [0], [0], [1], [0, 0, 1, 1], [], []>} : vector<4x32xf32>, vector<32x32xf32>, vector<4x32xf32> -> vector<4x32xf32>
    %c0_44 = arith.constant 0 : index
    %c0_45 = arith.constant 0 : index
    %52 = vector.load %arg18[%c0_44, %c0_45] : memref<1x32xf32, #tpu.memory_space<vmem>>, vector<1x32xf32>
    %53 = vector.broadcast %52 : vector<1x32xf32> to vector<4x32xf32>
    %54 = arith.addf %51, %53 : vector<4x32xf32>
    %cst_46 = arith.constant 0.000000e+00 : f32
    %55 = vector.broadcast %cst_46 : f32 to vector<4x32xf32>
    %56 = arith.maximumf %54, %55 : vector<4x32xf32>
    %c0_47 = arith.constant 0 : index
    %c0_48 = arith.constant 0 : index
    %57 = vector.load %arg19[%c0_47, %c0_48] : memref<32x32xf32, #tpu.memory_space<vmem>>, vector<32x32xf32>
    %cst_49 = arith.constant dense<0.000000e+00> : vector<4x32xf32>
    %58 = tpu.matmul %56, %57, %cst_49 {dimension_numbers = #tpu.dot_dimension_numbers<[1], [0], [0], [1], [0, 0, 1, 1], [], []>} : vector<4x32xf32>, vector<32x32xf32>, vector<4x32xf32> -> vector<4x32xf32>
    %c0_50 = arith.constant 0 : index
    %c0_51 = arith.constant 0 : index
    %59 = vector.load %arg20[%c0_50, %c0_51] : memref<1x32xf32, #tpu.memory_space<vmem>>, vector<1x32xf32>
    %60 = vector.broadcast %59 : vector<1x32xf32> to vector<4x32xf32>
    %61 = arith.addf %58, %60 : vector<4x32xf32>
    %62 = arith.addf %61, %49 : vector<4x32xf32>
    %cst_52 = arith.constant 0.000000e+00 : f32
    %63 = vector.broadcast %cst_52 : f32 to vector<4x32xf32>
    %64 = arith.maximumf %62, %63 : vector<4x32xf32>
    %c0_53 = arith.constant 0 : index
    %c0_54 = arith.constant 0 : index
    %65 = vector.load %arg21[%c0_53, %c0_54] : memref<32x32xf32, #tpu.memory_space<vmem>>, vector<32x32xf32>
    %cst_55 = arith.constant dense<0.000000e+00> : vector<4x32xf32>
    %66 = tpu.matmul %64, %65, %cst_55 {dimension_numbers = #tpu.dot_dimension_numbers<[1], [0], [0], [1], [0, 0, 1, 1], [], []>} : vector<4x32xf32>, vector<32x32xf32>, vector<4x32xf32> -> vector<4x32xf32>
    %c0_56 = arith.constant 0 : index
    %c0_57 = arith.constant 0 : index
    %67 = vector.load %arg22[%c0_56, %c0_57] : memref<1x32xf32, #tpu.memory_space<vmem>>, vector<1x32xf32>
    %68 = vector.broadcast %67 : vector<1x32xf32> to vector<4x32xf32>
    %69 = arith.addf %66, %68 : vector<4x32xf32>
    %cst_58 = arith.constant 0.000000e+00 : f32
    %70 = vector.broadcast %cst_58 : f32 to vector<4x32xf32>
    %71 = arith.maximumf %69, %70 : vector<4x32xf32>
    %c0_59 = arith.constant 0 : index
    %c0_60 = arith.constant 0 : index
    %72 = vector.load %arg23[%c0_59, %c0_60] : memref<32x32xf32, #tpu.memory_space<vmem>>, vector<32x32xf32>
    %cst_61 = arith.constant dense<0.000000e+00> : vector<4x32xf32>
    %73 = tpu.matmul %71, %72, %cst_61 {dimension_numbers = #tpu.dot_dimension_numbers<[1], [0], [0], [1], [0, 0, 1, 1], [], []>} : vector<4x32xf32>, vector<32x32xf32>, vector<4x32xf32> -> vector<4x32xf32>
    %c0_62 = arith.constant 0 : index
    %c0_63 = arith.constant 0 : index
    %74 = vector.load %arg24[%c0_62, %c0_63] : memref<1x32xf32, #tpu.memory_space<vmem>>, vector<1x32xf32>
    %75 = vector.broadcast %74 : vector<1x32xf32> to vector<4x32xf32>
    %76 = arith.addf %73, %75 : vector<4x32xf32>
    %77 = arith.addf %76, %64 : vector<4x32xf32>
    %cst_64 = arith.constant 0.000000e+00 : f32
    %78 = vector.broadcast %cst_64 : f32 to vector<4x32xf32>
    %79 = arith.maximumf %77, %78 : vector<4x32xf32>
    %c0_65 = arith.constant 0 : index
    %c0_66 = arith.constant 0 : index
    %80 = vector.load %arg25[%c0_65, %c0_66] : memref<32x128xf32, #tpu.memory_space<vmem>>, vector<32x128xf32>
    %cst_67 = arith.constant dense<0.000000e+00> : vector<4x128xf32>
    %81 = tpu.matmul %79, %80, %cst_67 {dimension_numbers = #tpu.dot_dimension_numbers<[1], [0], [0], [1], [0, 0, 1, 1], [], []>} : vector<4x32xf32>, vector<32x128xf32>, vector<4x128xf32> -> vector<4x128xf32>
    %c0_68 = arith.constant 0 : index
    %c0_69 = arith.constant 0 : index
    %82 = vector.load %arg26[%c0_68, %c0_69] : memref<1x128xf32, #tpu.memory_space<vmem>>, vector<1x128xf32>
    %83 = vector.broadcast %82 : vector<1x128xf32> to vector<4x128xf32>
    %84 = arith.addf %81, %83 : vector<4x128xf32>
    %c0_70 = arith.constant 0 : index
    %c0_71 = arith.constant 0 : index
    %85 = vector.load %arg27[%c0_70, %c0_71] : memref<8x16xf32, #tpu.memory_space<vmem>>, vector<8x16xf32>
    %cst_72 = arith.constant dense<0.000000e+00> : vector<4x16xf32>
    %86 = tpu.matmul %42, %85, %cst_72 {dimension_numbers = #tpu.dot_dimension_numbers<[1], [0], [0], [1], [0, 0, 1, 1], [], []>} : vector<4x8xf32>, vector<8x16xf32>, vector<4x16xf32> -> vector<4x16xf32>
    %87 = math.cos %86 : vector<4x16xf32>
    %c0_73 = arith.constant 0 : index
    %c0_74 = arith.constant 0 : index
    %88 = vector.load %arg30[%c0_73, %c0_74] : memref<1x16xf32, #tpu.memory_space<vmem>>, vector<1x16xf32>
    %89 = vector.broadcast %88 : vector<1x16xf32> to vector<4x16xf32>
    %90 = arith.mulf %87, %89 : vector<4x16xf32>
    %91 = math.sin %86 : vector<4x16xf32>
    %c0_75 = arith.constant 0 : index
    %c0_76 = arith.constant 0 : index
    %92 = vector.load %arg29[%c0_75, %c0_76] : memref<1x16xf32, #tpu.memory_space<vmem>>, vector<1x16xf32>
    %93 = vector.broadcast %92 : vector<1x16xf32> to vector<4x16xf32>
    %94 = arith.mulf %91, %93 : vector<4x16xf32>
    %c0_77 = arith.constant 0 : index
    %c0_78 = arith.constant 0 : index
    %95 = vector.load %arg0[%c0_77, %c0_78] : memref<4x16xf32, #tpu.memory_space<vmem>>, vector<4x16xf32>
    %c0_79 = arith.constant 0 : index
    %c0_80 = arith.constant 0 : index
    %96 = vector.load %arg28[%c0_79, %c0_80] : memref<16x16xf32, #tpu.memory_space<vmem>>, vector<16x16xf32>
    %cst_81 = arith.constant dense<0.000000e+00> : vector<4x16xf32>
    %97 = tpu.matmul %95, %96, %cst_81 {dimension_numbers = #tpu.dot_dimension_numbers<[1], [0], [0], [1], [0, 0, 1, 1], [], []>} : vector<4x16xf32>, vector<16x16xf32>, vector<4x16xf32> -> vector<4x16xf32>
    %98 = arith.mulf %95, %90 : vector<4x16xf32>
    %99 = arith.mulf %97, %94 : vector<4x16xf32>
    %100 = arith.addf %98, %99 : vector<4x16xf32>
    %c0_82 = arith.constant 0 : index
    %c0_83 = arith.constant 0 : index
    %101 = vector.load %arg1[%c0_82, %c0_83] : memref<4x8xf32, #tpu.memory_space<vmem>>, vector<4x8xf32>
    %c0_84 = arith.constant 0 : index
    %c0_85 = arith.constant 0 : index
    %102 = vector.load %arg31[%c0_84, %c0_85] : memref<8x128xf32, #tpu.memory_space<vmem>>, vector<8x128xf32>
    %cst_86 = arith.constant dense<0.000000e+00> : vector<4x128xf32>
    %103 = tpu.matmul %101, %102, %cst_86 {dimension_numbers = #tpu.dot_dimension_numbers<[1], [0], [0], [1], [0, 0, 1, 1], [], []>} : vector<4x8xf32>, vector<8x128xf32>, vector<4x128xf32> -> vector<4x128xf32>
    %104 = arith.mulf %103, %84 : vector<4x128xf32>
    %c0_87 = arith.constant 0 : index
    %c0_88 = arith.constant 0 : index
    %105 = vector.load %arg32[%c0_87, %c0_88] : memref<128x16xf32, #tpu.memory_space<vmem>>, vector<128x16xf32>
    %cst_89 = arith.constant dense<0.000000e+00> : vector<4x16xf32>
    %106 = tpu.matmul %104, %105, %cst_89 {dimension_numbers = #tpu.dot_dimension_numbers<[1], [0], [0], [1], [0, 0, 1, 1], [], []>} : vector<4x128xf32>, vector<128x16xf32>, vector<4x16xf32> -> vector<4x16xf32>
    %107 = arith.addf %100, %106 : vector<4x16xf32>
    %c0_90 = arith.constant 0 : index
    %c0_91 = arith.constant 0 : index
    %108 = vector.load %arg33[%c0_90, %c0_91] : memref<4x16xf32, #tpu.memory_space<vmem>>, vector<4x16xf32>
    tpu.vector_store %arg33[%c0_90, %c0_91], %107 {strides = array<i32>} : memref<4x16xf32, #tpu.memory_space<vmem>>, vector<4x16xf32>,
    return
  }
}

</mosaic_0001>

<bundles_post_ra>
// kernel: tpu_custom_call.1
= control target key start
LH: loop header
LB: loop body
LE: loop exit
PB: predicated region body
PF: predicated region fallthrough
CT: control target
= control target key end

     0   :  { %s2941_s6 = smov 1   ;;  %s2942_s10 = smov 2   ;;  %s3424_s0 = inlined_call_operand.smem [shape: u32[34], index: -1, kind: input, shape index: {}] }
   0x1   :  { %s3017_s5 = sld [smem:[%s3424_s0]]   ;;  %s2943_s14 = smov 3  }
   0x2   :  { %s3022_s9 = sld [smem:[%s3424_s0 + %s2941_s6]]   ;;  %s2944_s18 = smov 4  }
   0x3   :  { %s3027_s13 = sld [smem:[%s3424_s0 + %s2942_s10]]   ;;  %s2945_s22 = smov 5  }
   0x4   :  { %s3032_s17 = sld [smem:[%s3424_s0 + %s2943_s14]]   ;;  %s2946_s26 = smov 6  }
   0x5   :  { %s3037_s21 = sld [smem:[%s3424_s0 + %s2944_s18]]   ;;  %s2947_s30 = smov 7  }
   0x6   :  { %s3042_s25 = sld [smem:[%s3424_s0 + %s2945_s22]]   ;;  %s2948_s4 = smov 8  }
   0x7   :  { %s3047_s29 = sld [smem:[%s3424_s0 + %s2946_s26]]   ;;  %s2949_s10 = smov 9  }
   0x8   :  { %s3052_s3 = sld [smem:[%s3424_s0 + %s2947_s30]]   ;;  %s2950_s15 = smov 10  }
   0x9   :  { %s3057_s8 = sld [smem:[%s3424_s0 + %s2948_s4]]   ;;  %s2951_s20 = smov 11  }
   0xa   :  { %s3062_s14 = sld [smem:[%s3424_s0 + %s2949_s10]]   ;;  %s2952_s26 = smov 12  }
   0xb   :  { %s3067_s19 = sld [smem:[%s3424_s0 + %s2950_s15]]   ;;  %s2953_s1 = smov 13  }
   0xc   :  { %3433 = sst [smem:[#allocation55_spill]] %s3042_s25  ;;  %s2954_s7 = smov 14  }
   0xd   :  { %s3072_s24 = sld [smem:[%s3424_s0 + %s2951_s20]]   ;;  %s2955_s15 = smov 15  }
   0xe   :  { %3434 = sst [smem:[#allocation56_spill]] %s3052_s3  ;;  %s2956_s22 = smov 16  }
   0xf   :  { %3435 = sst [smem:[#allocation57_spill]] %s3057_s8  ;;  %s2957_s28 = smov 17  }
  0x10   :  { %3436 = sst [smem:[#allocation58_spill]] %s3062_s14 }
  0x11   :  { %s3077_s30 = sld [smem:[%s3424_s0 + %s2952_s26]]  }
  0x12   :  { %s3082_s6 = sld [smem:[%s3424_s0 + %s2953_s1]]  }
  0x13   :  { %3437 = sst [smem:[#allocation59_spill]] %s3072_s24 }
  0x14   :  { %s3087_s12 = sld [smem:[%s3424_s0 + %s2954_s7]]   ;;  %s2958_s7 = smov 18  }
  0x15   :  { %s3092_s20 = sld [smem:[%s3424_s0 + %s2955_s15]]   ;;  %s2959_s15 = smov 19  }
  0x16   :  { %s3097_s27 = sld [smem:[%s3424_s0 + %s2956_s22]]   ;;  %s2960_s22 = smov 20  }
  0x17   :  { %3438 = sst [smem:[#allocation60_spill]] %s3077_s30 }
  0x18   :  { %3439 = sst [smem:[#allocation61_spill]] %s3082_s6 }
  0x19   :  { %s3102_s4 = sld [smem:[%s3424_s0 + %s2957_s28]]   ;;  %s2961_s28 = smov 21  }
  0x1a   :  { %s3107_s6 = sld [smem:[%s3424_s0 + %s2958_s7]]   ;;  %s2962_s7 = smov 22  }
  0x1b   :  { %3440 = sst [smem:[#allocation62_spill]] %s3092_s20 }
  0x1c   :  { %s3112_s24 = sld [smem:[%s3424_s0 + %s2959_s15]]   ;;  %s2963_s15 = smov 23  }
  0x1d   :  { %s3117_s14 = sld [smem:[%s3424_s0 + %s2960_s22]]   ;;  %s2964_s22 = smov 24  }
  0x1e   :  { %s3127_s3 = sld [smem:[%s3424_s0 + %s2962_s7]]   ;;  %s2966_s7 = smov 26  }
  0x1f   :  { %3441 = sst [smem:[#allocation63_spill]] %s3102_s4 }
  0x20   :  { %3442 = sst [smem:[#allocation64_spill]] %s3107_s6 }
  0x21   :  { %s3122_s4 = sld [smem:[%s3424_s0 + %s2961_s28]]   ;;  %s2965_s28 = smov 25  }
  0x22   :  { %3443 = sst [smem:[#allocation65_spill]] %s3112_s24 }
  0x23   :  { %s3132_s24 = sld [smem:[%s3424_s0 + %s2963_s15]]   ;;  %s2967_s15 = smov 27  }
  0x24   :  { %s3137_s25 = sld [smem:[%s3424_s0 + %s2964_s22]]   ;;  %s2968_s22 = smov 28  }
  0x25   :  { %s3147_s6 = sld [smem:[%s3424_s0 + %s2966_s7]]   ;;  %s2970_s7 = smov 30  }
  0x27   :  { %3444 = sst [smem:[#allocation66_spill]] %s3122_s4 }
  0x28   :  { %s3142_s4 = sld [smem:[%s3424_s0 + %s2965_s28]]   ;;  %s2969_s28 = smov 29  }
  0x29   :  { %3445 = sst [smem:[#allocation67_spill]] %s3132_s24 }
  0x2a   :  { %3446 = sst [smem:[#allocation68_spill]] %s3137_s25 }
  0x2b   :  { %3447 = sst [smem:[#allocation69_spill]] %s3147_s6 }
  0x2c   :  { %s3152_s24 = sld [smem:[%s3424_s0 + %s2967_s15]]   ;;  %s2971_s15 = smov 31  }
  0x2d   :  { %s3157_s25 = sld [smem:[%s3424_s0 + %s2968_s22]]   ;;  %s2972_s22 = smov 32  }
  0x2e   :  { %s3162_s20 = sld [smem:[%s3424_s0 + %s2969_s28]]   ;;  %s2973_s28 = smov 33  }
  0x2f   :  { %s3167_s6 = sld [smem:[%s3424_s0 + %s2970_s7]]  }
  0x30   :  { %s3172_s30 = sld [smem:[%s3424_s0 + %s2971_s15]]  }
  0x31   :  { %s3182_s8 = sld [smem:[%s3424_s0 + %s2973_s28]]  }
  0x33   :  { %3448 = sst [smem:[#allocation70_spill]] %s3157_s25 }
  0x34   :  { %s3177_s25 = sld [smem:[%s3424_s0 + %s2972_s22]]  }
  0x35   :  { %72 = vsyncpa [#allocation3], 0 }
  0x36   :  { %73 = vsyncpa [#allocation6], 0 }
  0x37   :  { %74 = vsyncpa [#allocation9], 0 }
  0x38   :  { %75 = vsyncpa [#allocation12], 0 }
  0x39   :  { %76 = vsyncpa [#allocation15], 0 }
  0x3a   :  { %77 = vsyncpa [#allocation18], 0 }
  0x3b   :  { %78 = vsyncpa [#allocation21], 0 }
  0x3c   :  { %79 = vsyncpa [#allocation24], 0 }
  0x3d   :  { %80 = vsyncpa [#allocation27], 0 }
  0x3e   :  { %81 = vsyncpa [#allocation30], 0 }
  0x3f   :  { %82 = vsyncpa [#allocation33], 0 }
  0x40   :  { %83 = vsyncpa [#allocation36], 0 }
  0x41   :  { %84 = vsyncpa [#allocation39], 0 }
  0x42   :  { %85 = vsyncpa [#allocation4], 0  ;;  %s2974_s7 = smov [#allocation5]   ;;  %s2975_s11 = smov [#allocation8]  }
  0x43   :  { %s102_s10 = sshll.u32 %s2974_s7, 4  ;;  %s122_s15 = sshll.u32 %s2975_s11, 4  ;;  %s103_s10 = int_to_ptr.vmem [resolvable:$true] %s102_s10  ;;  %s123_s15 = int_to_ptr.vmem [resolvable:$true] %s122_s15 }
  0x44   :  { %s2421_s0 = scalar_lea.vmem %s103_s10, 64  ;;  %p2426_p1 = scmp.lt.s32.totalorder %s103_s10, %s103_s10 }
  0x45   :  { %p2422_p0 = scmp.ne.s32.totalorder %s103_s10, %s2421_s0  ;;  %p2427_p2 = scmp.lt.s32.totalorder %s2421_s0, %s2421_s0 }
  0x47   :  { %p2428_p3 = por %p2427_p2, %p2426_p1 }
  0x49   :  { %p2429_p4 = pnand %p2428_p3, %p2422_p0 }
  0x4b   :  { %2432 = shalt.err (!%p2429_p4)
}
  0x4c   :  { %105 = dma.hbm_to_vmem [thread:$0]  %s3022_s9, 64, %s103_s10, [#allocation6]  }
  0x4d   :  { %s2441_s16 = scalar_lea.vmem %s123_s15, 64  ;;  %p2446_p6 = scmp.lt.s32.totalorder %s123_s15, %s123_s15 }
  0x4e   :  { %p2442_p5 = scmp.ne.s32.totalorder %s123_s15, %s2441_s16  ;;  %p2447_p7 = scmp.lt.s32.totalorder %s2441_s16, %s2441_s16 }
  0x50   :  { %p2448_p8 = por %p2447_p7, %p2446_p6 }
  0x52   :  { %p2449_p9 = pnand %p2448_p8, %p2442_p5 }
  0x54   :  { %2452 = shalt.err (!%p2449_p9)
}
  0x55   :  { %125 = dma.hbm_to_vmem [thread:$0]  %s3032_s17, 64, %s123_s15, [#allocation9]  }
  0x56   :  { %s2976_s18 = smov [#allocation11]   ;;  %s2977_s23 = smov [#allocation14]  }
  0x57   :  { %s144_s22 = sshll.u32 %s2976_s18, 4  ;;  %s168_s26 = sshll.u32 %s2977_s23, 4  ;;  %s145_s22 = int_to_ptr.vmem [resolvable:$true] %s144_s22  ;;  %s169_s26 = int_to_ptr.vmem [resolvable:$true] %s168_s26 }
  0x58   :  { %s2461_s28 = scalar_lea.vmem %s145_s22, 16  ;;  %s2465_s1 = scalar_lea.vmem %s145_s22, 32 }
  0x59   :  { %p2462_p10 = scmp.ne.s32.totalorder %s145_s22, %s2461_s28  ;;  %p2466_p11 = scmp.lt.s32.totalorder %s145_s22, %s145_s22 }
  0x5a   :  { %p2467_p12 = scmp.lt.s32.totalorder %s2465_s1, %s2461_s28 }
  0x5c   :  { %p2468_p13 = por %p2467_p12, %p2466_p11 }
  0x5e   :  { %p2469_p0 = pnand %p2468_p13, %p2462_p10 }
  0x60   :  { %2472 = shalt.err (!%p2469_p0)
}
  0x61   :  { %147 = dma.hbm_to_vmem [thread:$0]  %s3047_s29, 16, %s145_s22, [#allocation12]  }
  0x62   :  { %s2481_s9 = scalar_lea.vmem %s169_s26, 16  ;;  %s2485_s2 = scalar_lea.vmem %s169_s26, 32 }
  0x63   :  { %p2482_p1 = scmp.ne.s32.totalorder %s169_s26, %s2481_s9  ;;  %p2486_p2 = scmp.lt.s32.totalorder %s169_s26, %s169_s26 }
  0x64   :  { %p2487_p3 = scmp.lt.s32.totalorder %s2485_s2, %s2481_s9 }
  0x66   :  { %p2488_p4 = por %p2487_p3, %p2486_p2 }
  0x68   :  { %p2489_p5 = pnand %p2488_p4, %p2482_p1 }
  0x6a   :  { %2492 = shalt.err (!%p2489_p5)
}
  0x6b   :  { %171 = dma.hbm_to_vmem [thread:$0]  %s3067_s19, 16, %s169_s26, [#allocation15]  }
  0x6c   :  { %s2978_s17 = smov [#allocation17]   ;;  %s2979_s10 = smov [#allocation20]  }
  0x6d   :  { %s192_s7 = sshll.u32 %s2978_s17, 4  ;;  %s212_s11 = sshll.u32 %s2979_s10, 4  ;;  %s193_s7 = int_to_ptr.vmem [resolvable:$true] %s192_s7  ;;  %s213_s11 = int_to_ptr.vmem [resolvable:$true] %s212_s11 }
  0x6e   :  { %s2501_s15 = scalar_lea.vmem %s193_s7, 16  ;;  %s2505_s0 = scalar_lea.vmem %s193_s7, 32 }
  0x6f   :  { %p2502_p6 = scmp.ne.s32.totalorder %s193_s7, %s2501_s15  ;;  %p2506_p7 = scmp.lt.s32.totalorder %s193_s7, %s193_s7 }
  0x70   :  { %p2507_p8 = scmp.lt.s32.totalorder %s2505_s0, %s2501_s15 }
  0x72   :  { %p2508_p9 = por %p2507_p8, %p2506_p7 }
  0x74   :  { %p2509_p10 = pnand %p2508_p9, %p2502_p6 }
  0x76   :  { %2512 = shalt.err (!%p2509_p10)
}
  0x77   :  { %195 = dma.hbm_to_vmem [thread:$0]  %s3087_s12, 16, %s193_s7, [#allocation18]  }
  0x78   :  { %s2521_s29 = scalar_lea.vmem %s213_s11, 16  ;;  %s2525_s16 = scalar_lea.vmem %s213_s11, 32 }
  0x79   :  { %p2522_p11 = scmp.ne.s32.totalorder %s213_s11, %s2521_s29  ;;  %p2526_p12 = scmp.lt.s32.totalorder %s213_s11, %s213_s11 }
  0x7a   :  { %p2527_p13 = scmp.lt.s32.totalorder %s2525_s16, %s2521_s29 }
  0x7c   :  { %p2528_p0 = por %p2527_p13, %p2526_p12 }
  0x7e   :  { %p2529_p1 = pnand %p2528_p0, %p2522_p11 }
  0x80   :  { %2532 = shalt.err (!%p2529_p1)
}
  0x81   :  { %215 = dma.hbm_to_vmem [thread:$0]  %s3097_s27, 16, %s213_s11, [#allocation21]  }
  0x82   :  { %s2980_s19 = smov [#allocation23]   ;;  %s2981_s22 = smov [#allocation26]  }
  0x83   :  { %s236_s18 = sshll.u32 %s2980_s19, 4  ;;  %s258_s23 = sshll.u32 %s2981_s22, 4  ;;  %s237_s18 = int_to_ptr.vmem [resolvable:$true] %s236_s18  ;;  %s259_s23 = int_to_ptr.vmem [resolvable:$true] %s258_s23 }
  0x84   :  { %s2541_s26 = scalar_lea.vmem %s237_s18, 16  ;;  %s2545_s28 = scalar_lea.vmem %s237_s18, 32 }
  0x85   :  { %p2542_p2 = scmp.ne.s32.totalorder %s237_s18, %s2541_s26  ;;  %p2546_p3 = scmp.lt.s32.totalorder %s237_s18, %s237_s18 }
  0x86   :  { %p2547_p4 = scmp.lt.s32.totalorder %s2545_s28, %s2541_s26 }
  0x88   :  { %p2548_p5 = por %p2547_p4, %p2546_p3 }
  0x8a   :  { %p2549_p6 = pnand %p2548_p5, %p2542_p2 }
  0x8c   :  { %2552 = shalt.err (!%p2549_p6)
}
  0x8d   :  { %239 = dma.hbm_to_vmem [thread:$0]  %s3117_s14, 16, %s237_s18, [#allocation24]  }
  0x8e   :  { %s2561_s12 = scalar_lea.vmem %s259_s23, 16  ;;  %s2565_s1 = scalar_lea.vmem %s259_s23, 32 }
  0x8f   :  { %p2562_p7 = scmp.ne.s32.totalorder %s259_s23, %s2561_s12  ;;  %p2566_p8 = scmp.lt.s32.totalorder %s259_s23, %s259_s23 }
  0x90   :  { %p2567_p9 = scmp.lt.s32.totalorder %s2565_s1, %s2561_s12 }
  0x92   :  { %p2568_p10 = por %p2567_p9, %p2566_p8 }
  0x94   :  { %p2569_p11 = pnand %p2568_p10, %p2562_p7 }
  0x96   :  { %2572 = shalt.err (!%p2569_p11)
}
  0x97   :  { %261 = dma.hbm_to_vmem [thread:$0]  %s3127_s3, 16, %s259_s23, [#allocation27]  }
  0x98   :  { %s2982_s27 = smov [#allocation29]   ;;  %s2983_s2 = smov [#allocation32]  }
  0x99   :  { %s279_s9 = sshll.u32 %s2982_s27, 4  ;;  %s302_s17 = sshll.u32 %s2983_s2, 4  ;;  %s280_s9 = int_to_ptr.vmem [resolvable:$true] %s279_s9  ;;  %s303_s17 = int_to_ptr.vmem [resolvable:$true] %s302_s17 }
  0x9a   :  { %s2581_s7 = scalar_lea.vmem %s280_s9, 512  ;;  %p2586_p13 = scmp.lt.s32.totalorder %s280_s9, %s280_s9 }
  0x9b   :  { %p2582_p12 = scmp.ne.s32.totalorder %s280_s9, %s2581_s7  ;;  %p2587_p0 = scmp.lt.s32.totalorder %s2581_s7, %s2581_s7 }
  0x9d   :  { %p2588_p1 = por %p2587_p0, %p2586_p13 }
  0x9f   :  { %p2589_p2 = pnand %p2588_p1, %p2582_p12 }
  0xa1   :  { %2592 = shalt.err (!%p2589_p2)
}
  0xa2   :  { %s2984_s14 = smov 128   ;;  %s2985_s10 = smov 8  }
  0xa3   :  { %285 = dma.hbm_to_vmem [thread:$0]  %s3142_s4, 512, %s280_s9, [#allocation30], %s2984_s14, %s2984_s14, %s2985_s10  }
  0xa4   :  { %s2601_s3 = scalar_lea.vmem %s303_s17, 128  ;;  %p2606_p4 = scmp.lt.s32.totalorder %s303_s17, %s303_s17 }
  0xa5   :  { %p2602_p3 = scmp.ne.s32.totalorder %s303_s17, %s2601_s3  ;;  %p2607_p5 = scmp.lt.s32.totalorder %s2601_s3, %s2601_s3 }
  0xa7   :  { %p2608_p6 = por %p2607_p5, %p2606_p4 }
  0xa9   :  { %p2609_p7 = pnand %p2608_p6, %p2602_p3 }
  0xab   :  { %2612 = shalt.err (!%p2609_p7)
}
  0xac   :  { %305 = dma.hbm_to_vmem [thread:$0]  %s3152_s24, 128, %s303_s17, [#allocation33]  }
  0xad   :  { %s2986_s11 = smov [#allocation35]   ;;  %s2987_s0 = smov [#allocation2]  }
  0xae   :  { %s324_s15 = sshll.u32 %s2986_s11, 4  ;;  %s92_s29 = sshll.u32 %s2987_s0, 4  ;;  %s325_s15 = int_to_ptr.vmem [resolvable:$true] %s324_s15  ;;  %s93_s29 = int_to_ptr.vmem [resolvable:$true] %s92_s29 }
  0xaf   :  { %s2621_s16 = scalar_lea.vmem %s325_s15, 16  ;;  %s2625_s19 = scalar_lea.vmem %s325_s15, 32 }
  0xb0   :  { %p2622_p8 = scmp.ne.s32.totalorder %s325_s15, %s2621_s16  ;;  %p2626_p9 = scmp.lt.s32.totalorder %s325_s15, %s325_s15 }
  0xb1   :  { %p2627_p10 = scmp.lt.s32.totalorder %s2625_s19, %s2621_s16 }
  0xb3   :  { %p2628_p11 = por %p2627_p10, %p2626_p9 }
  0xb5   :  { %p2629_p12 = pnand %p2628_p11, %p2622_p8 }
  0xb7   :  { %2632 = shalt.err (!%p2629_p12)
}
  0xb8   :  { %327 = dma.hbm_to_vmem [thread:$0]  %s3162_s20, 16, %s325_s15, [#allocation36]  }
  0xb9   :  { %s2641_s4 = scalar_lea.vmem %s93_s29, 64  ;;  %p2646_p0 = scmp.lt.s32.totalorder %s93_s29, %s93_s29 }
  0xba   :  { %p2642_p13 = scmp.ne.s32.totalorder %s93_s29, %s2641_s4  ;;  %p2647_p1 = scmp.lt.s32.totalorder %s2641_s4, %s2641_s4 }
  0xbc   :  { %p2648_p2 = por %p2647_p1, %p2646_p0 }
  0xbe   :  { %p2649_p3 = pnand %p2648_p2, %p2642_p13 }
  0xc0   :  { %2652 = shalt.err (!%p2649_p3)
}
  0xc1   :  { %95 = dma.hbm_to_vmem [thread:$0]  %s3017_s5, 64, %s93_s29, [#allocation3]  }
  0xc2   :  { %s2988_s24 = smov [#allocation7]   ;;  %s2989_s22 = smov [#allocation10]  }
  0xc3   :  { %s112_s18 = sshll.u32 %s2988_s24, 4  ;;  %s132_s23 = sshll.u32 %s2989_s22, 4  ;;  %s113_s18 = int_to_ptr.vmem [resolvable:$true] %s112_s18  ;;  %s133_s23 = int_to_ptr.vmem [resolvable:$true] %s132_s23 }
  0xc4   :  { %s2661_s26 = scalar_lea.vmem %s113_s18, 64  ;;  %p2666_p5 = scmp.lt.s32.totalorder %s113_s18, %s113_s18 }
  0xc5   :  { %p2662_p4 = scmp.ne.s32.totalorder %s113_s18, %s2661_s26  ;;  %p2667_p6 = scmp.lt.s32.totalorder %s2661_s26, %s2661_s26 }
  0xc7   :  { %p2668_p7 = por %p2667_p6, %p2666_p5 }
  0xc9   :  { %p2669_p8 = pnand %p2668_p7, %p2662_p4 }
  0xcb   :  { %2672 = shalt.err (!%p2669_p8)
}
  0xcc   :  { %115 = dma.hbm_to_vmem [thread:$0]  %s3027_s13, 64, %s113_s18, [#allocation6]  }
  0xcd   :  { %s2681_s20 = scalar_lea.vmem %s133_s23, 16  ;;  %s2685_s28 = scalar_lea.vmem %s133_s23, 32 }
  0xce   :  { %p2682_p9 = scmp.ne.s32.totalorder %s133_s23, %s2681_s20  ;;  %p2686_p10 = scmp.lt.s32.totalorder %s133_s23, %s133_s23 }
  0xcf   :  { %p2687_p11 = scmp.lt.s32.totalorder %s2685_s28, %s2681_s20 }
  0xd1   :  { %p2688_p12 = por %p2687_p11, %p2686_p10 }
  0xd3   :  { %p2689_p13 = pnand %p2688_p12, %p2682_p9 }
  0xd5   :  { %2692 = shalt.err (!%p2689_p13)
}
  0xd6   :  { %135 = dma.hbm_to_vmem [thread:$0]  %s3037_s21, 16, %s133_s23, [#allocation9]  }
  0xd7   :  { %s2990_s5 = smov [#allocation13]   ;;  %s2991_s1 = smov [#allocation16]  }
  0xd8   :  { %s156_s12 = sshll.u32 %s2990_s5, 4  ;;  %s180_s27 = sshll.u32 %s2991_s1, 4  ;;  %s157_s12 = int_to_ptr.vmem [resolvable:$true] %s156_s12  ;;  %s181_s27 = int_to_ptr.vmem [resolvable:$true] %s180_s27 }
  0xd9   :  { %s2701_s9 = scalar_lea.vmem %s157_s12, 16  ;;  %s2705_s2 = scalar_lea.vmem %s157_s12, 32 }
  0xda   :  { %p2702_p0 = scmp.ne.s32.totalorder %s157_s12, %s2701_s9  ;;  %p2706_p1 = scmp.lt.s32.totalorder %s157_s12, %s157_s12 }
  0xdb   :  { %p2707_p2 = scmp.lt.s32.totalorder %s2705_s2, %s2701_s9 }
  0xdd   :  { %p2708_p3 = por %p2707_p2, %p2706_p1 }
  0xdf   :  { %p2709_p4 = pnand %p2708_p3, %p2702_p0 }
  0xe1   :  { %2712 = shalt.err (!%p2709_p4)
}
  0xe2   :  { %s3449_s13 = sld [smem:[#allocation57_spill]]  ;;  %s2721_s17 = scalar_lea.vmem %s181_s27, 16 }
  0xe3   :  { %p2722_p5 = scmp.ne.s32.totalorder %s181_s27, %s2721_s17  ;;  %s2725_s7 = scalar_lea.vmem %s181_s27, 32 }
  0xe4   :  { %p2726_p6 = scmp.lt.s32.totalorder %s181_s27, %s181_s27  ;;  %p2727_p7 = scmp.lt.s32.totalorder %s2725_s7, %s2721_s17 }
  0xe6   :  { %p2728_p8 = por %p2727_p7, %p2726_p6 }
  0xe8   :  { %159 = dma.hbm_to_vmem [thread:$0]  %s3449_s13, 16, %s157_s12, [#allocation12]  }
  0xe9   :  { %p2729_p9 = pnand %p2728_p8, %p2722_p5 }
  0xeb   :  { %2732 = shalt.err (!%p2729_p9)
}
  0xec   :  { %s3450_s21 = sld [smem:[#allocation60_spill]]  ;;  %s2992_s3 = smov [#allocation19]  }
  0xed   :  { %s202_s11 = sshll.u32 %s2992_s3, 4  ;;  %s2993_s15 = smov [#allocation22]   ;;  %s203_s11 = int_to_ptr.vmem [resolvable:$true] %s202_s11 }
  0xee   :  { %s224_s0 = sshll.u32 %s2993_s15, 4  ;;  %s2741_s29 = scalar_lea.vmem %s203_s11, 64  ;;  %s225_s0 = int_to_ptr.vmem [resolvable:$true] %s224_s0 }
  0xef   :  { %p2742_p10 = scmp.ne.s32.totalorder %s203_s11, %s2741_s29  ;;  %p2746_p11 = scmp.lt.s32.totalorder %s203_s11, %s203_s11 }
  0xf0   :  { %p2747_p12 = scmp.lt.s32.totalorder %s2741_s29, %s2741_s29 }
  0xf2   :  { %183 = dma.hbm_to_vmem [thread:$0]  %s3450_s21, 16, %s181_s27, [#allocation15]  }
  0xf3   :  { %p2748_p13 = por %p2747_p12, %p2746_p11 }
  0xf5   :  { %p2749_p0 = pnand %p2748_p13, %p2742_p10 }
  0xf7   :  { %2752 = shalt.err (!%p2749_p0)
}
  0xf8   :  { %s3451_s16 = sld [smem:[#allocation62_spill]]  ;;  %s2761_s19 = scalar_lea.vmem %s225_s0, 16 }
  0xf9   :  { %p2762_p1 = scmp.ne.s32.totalorder %s225_s0, %s2761_s19  ;;  %s2765_s4 = scalar_lea.vmem %s225_s0, 32 }
  0xfa   :  { %p2766_p2 = scmp.lt.s32.totalorder %s225_s0, %s225_s0  ;;  %p2767_p3 = scmp.lt.s32.totalorder %s2765_s4, %s2761_s19 }
  0xfc   :  { %p2768_p4 = por %p2767_p3, %p2766_p2 }
  0xfe   :  { %205 = dma.hbm_to_vmem [thread:$0]  %s3451_s16, 64, %s203_s11, [#allocation18]  }
  0xff   :  { %p2769_p5 = pnand %p2768_p4, %p2762_p1 }
 0x101   :  { %2772 = shalt.err (!%p2769_p5)
}
 0x102   :  { %s3452_s24 = sld [smem:[#allocation64_spill]]  ;;  %s2994_s18 = smov [#allocation25]  }
 0x103   :  { %s245_s22 = sshll.u32 %s2994_s18, 4  ;;  %s2995_s23 = smov [#allocation28]   ;;  %s246_s22 = int_to_ptr.vmem [resolvable:$true] %s245_s22 }
 0x104   :  { %s270_s26 = sshll.u32 %s2995_s23, 4  ;;  %s2781_s20 = scalar_lea.vmem %s246_s22, 512  ;;  %s271_s26 = int_to_ptr.vmem [resolvable:$true] %s270_s26 }
 0x105   :  { %p2782_p6 = scmp.ne.s32.totalorder %s246_s22, %s2781_s20  ;;  %p2786_p7 = scmp.lt.s32.totalorder %s246_s22, %s246_s22 }
 0x106   :  { %p2787_p8 = scmp.lt.s32.totalorder %s2781_s20, %s2781_s20 }
 0x108   :  { %227 = dma.hbm_to_vmem [thread:$0]  %s3452_s24, 16, %s225_s0, [#allocation21]  }
 0x109   :  { %p2788_p9 = por %p2787_p8, %p2786_p7 }
 0x10b   :  { %p2789_p10 = pnand %p2788_p9, %p2782_p6 }
 0x10d   :  { %2792 = shalt.err (!%p2789_p10)
}
 0x10e   :  { %s3453_s28 = sld [smem:[#allocation66_spill]]  ;;  %s2801_s5 = scalar_lea.vmem %s271_s26, 16 }
 0x10f   :  { %p2802_p11 = scmp.ne.s32.totalorder %s271_s26, %s2801_s5  ;;  %s2805_s12 = scalar_lea.vmem %s271_s26, 32 }
 0x110   :  { %p2806_p12 = scmp.lt.s32.totalorder %s271_s26, %s271_s26  ;;  %p2807_p13 = scmp.lt.s32.totalorder %s2805_s12, %s2801_s5 }
 0x112   :  { %p2808_p0 = por %p2807_p13, %p2806_p12 }
 0x114   :  { %251 = dma.hbm_to_vmem [thread:$0]  %s3453_s28, 512, %s246_s22, [#allocation24], %s2984_s14, %s2984_s14, %s2985_s10  }
 0x115   :  { %p2809_p1 = pnand %p2808_p0, %p2802_p11 }
 0x117   :  { %2812 = shalt.err (!%p2809_p1)
}
 0x118   :  { %s3454_s1 = sld [smem:[#allocation68_spill]]  ;;  %s2996_s27 = smov [#allocation31]  }
 0x119   :  { %s292_s9 = sshll.u32 %s2996_s27, 4  ;;  %s2997_s2 = smov [#allocation34]   ;;  %s293_s9 = int_to_ptr.vmem [resolvable:$true] %s292_s9 }
 0x11a   :  { %s311_s13 = sshll.u32 %s2997_s2, 4  ;;  %s2821_s17 = scalar_lea.vmem %s293_s9, 16  ;;  %s312_s13 = int_to_ptr.vmem [resolvable:$true] %s311_s13 }
 0x11b   :  { %p2822_p2 = scmp.ne.s32.totalorder %s293_s9, %s2821_s17  ;;  %s2825_s7 = scalar_lea.vmem %s293_s9, 32 }
 0x11c   :  { %p2826_p3 = scmp.lt.s32.totalorder %s293_s9, %s293_s9  ;;  %p2827_p4 = scmp.lt.s32.totalorder %s2825_s7, %s2821_s17 }
 0x11e   :  { %273 = dma.hbm_to_vmem [thread:$0]  %s3454_s1, 16, %s271_s26, [#allocation27]  }
 0x11f   :  { %p2828_p5 = por %p2827_p4, %p2826_p3 }
 0x121   :  { %p2829_p6 = pnand %p2828_p5, %p2822_p2 }
 0x123   :  { %2832 = shalt.err (!%p2829_p6)
}
 0x124   :  { %s3455_s21 = sld [smem:[#allocation69_spill]]  ;;  %s2841_s3 = scalar_lea.vmem %s312_s13, 256 }
 0x125   :  { %p2842_p7 = scmp.ne.s32.totalorder %s312_s13, %s2841_s3  ;;  %p2846_p8 = scmp.lt.s32.totalorder %s312_s13, %s312_s13 }
 0x126   :  { %p2847_p9 = scmp.lt.s32.totalorder %s2841_s3, %s2841_s3 }
 0x128   :  { %p2848_p10 = por %p2847_p9, %p2846_p8 }
 0x12a   :  { %295 = dma.hbm_to_vmem [thread:$0]  %s3455_s21, 16, %s293_s9, [#allocation30]  }
 0x12b   :  { %p2849_p11 = pnand %p2848_p10, %p2842_p7 }
 0x12d   :  { %2852 = shalt.err (!%p2849_p11)
}
 0x12e   :  { %s3456_s11 = sld [smem:[#allocation70_spill]]  ;;  %s2998_s15 = smov [#allocation37]  }
 0x12f   :  { %s334_s0 = sshll.u32 %s2998_s15, 4  ;;  %s2999_s29 = smov [#allocation38]   ;;  %s335_s0 = int_to_ptr.vmem [resolvable:$true] %s334_s0 }
 0x130   :  { %s344_s16 = sshll.u32 %s2999_s29, 4  ;;  %s2861_s19 = scalar_lea.vmem %s335_s0, 16  ;;  %s345_s16 = int_to_ptr.vmem [resolvable:$true] %s344_s16 }
 0x131   :  { %p2862_p12 = scmp.ne.s32.totalorder %s335_s0, %s2861_s19  ;;  %s2865_s4 = scalar_lea.vmem %s335_s0, 32 }
 0x132   :  { %p2866_p13 = scmp.lt.s32.totalorder %s335_s0, %s335_s0  ;;  %p2867_p0 = scmp.lt.s32.totalorder %s2865_s4, %s2861_s19 }
 0x134   :  { %317 = dma.hbm_to_vmem [thread:$0]  %s3456_s11, 256, %s312_s13, [#allocation33], %s2984_s14, %s2984_s14, %s2985_s10  }
 0x135   :  { %p2868_p1 = por %p2867_p0, %p2866_p13 }
 0x137   :  { %p2869_p2 = pnand %p2868_p1, %p2862_p12 }
 0x139   :  { %2872 = shalt.err (!%p2869_p2)
}
 0x13a   :  { %337 = dma.hbm_to_vmem [thread:$0]  %s3167_s6, 16, %s335_s0, [#allocation36]  }
 0x13b   :  { %s2881_s24 = scalar_lea.vmem %s345_s16, 128  ;;  %p2886_p4 = scmp.lt.s32.totalorder %s345_s16, %s345_s16 }
 0x13c   :  { %p2882_p3 = scmp.ne.s32.totalorder %s345_s16, %s2881_s24  ;;  %p2887_p5 = scmp.lt.s32.totalorder %s2881_s24, %s2881_s24 }
 0x13e   :  { %p2888_p6 = por %p2887_p5, %p2886_p4 }
 0x140   :  { %p2889_p7 = pnand %p2888_p6, %p2882_p3 }
 0x142   :  { %2892 = shalt.err (!%p2889_p7)
}
 0x143   :  { %347 = dma.hbm_to_vmem [thread:$0]  %s3172_s30, 128, %s345_s16, [#allocation39]  }
 0x144   :  { %2913 = dma.done.wait [#allocation3], 64  }
 0x145   :  { %2914 = vsyncadd [#allocation3], 4294967232 }
 0x146   :  { %2915 = dma.done.wait [#allocation6], 128  }
 0x147   :  { %2916 = vsyncadd [#allocation6], 4294967168 }
 0x148   :  { %2917 = dma.done.wait [#allocation9], 80  }
 0x149   :  { %2918 = vsyncadd [#allocation9], 4294967216 }
 0x14a   :  { %2919 = dma.done.wait [#allocation12], 32  }
 0x14b   :  { %2920 = vsyncadd [#allocation12], 4294967264 }
 0x14c   :  { %2921 = dma.done.wait [#allocation15], 32  }
 0x14d   :  { %2922 = vsyncadd [#allocation15], 4294967264 }
 0x14e   :  { %2923 = dma.done.wait [#allocation18], 80  }
 0x14f   :  { %2924 = vsyncadd [#allocation18], 4294967216 }
 0x150   :  { %2925 = dma.done.wait [#allocation21], 32  }
 0x151   :  { %2926 = vsyncadd [#allocation21], 4294967264 }
 0x152   :  { %2927 = dma.done.wait [#allocation24], 528  }
 0x153   :  { %2928 = vsyncadd [#allocation24], 4294966768 }
 0x154   :  { %2929 = dma.done.wait [#allocation27], 32  }
 0x155   :  { %2930 = vsyncadd [#allocation27], 4294967264 }
 0x156   :  { %2931 = dma.done.wait [#allocation30], 528  }
 0x157   :  { %2932 = vsyncadd [#allocation30], 4294966768 }
 0x158   :  { %2933 = dma.done.wait [#allocation33], 384  }
 0x159   :  { %2934 = vsyncadd [#allocation33], 4294966912 }
 0x15a   :  { %2935 = dma.done.wait [#allocation36], 32  }
 0x15b   :  { %2936 = vsyncadd [#allocation36], 4294967264 }
 0x15c   :  { %2937 = dma.done.wait [#allocation39], 128  }
 0x15d   :  { %2938 = vsyncadd [#allocation39], 4294967168  ;;  %s3457_s30 = sld [smem:[#allocation55_spill]]  ;;  %v3000_v0 = vmov 0.0   ;;  %vm3001_vm0 = vmmov 0   ;;  %vm435_vm1 = vcmask 1042432  }
 0x15e   :  { %2165 = vmatprep.subr.mxu0 %v3000_v0  ;;  %2167 = vmatprep.mubr.msk.f32.mxu0 %vm3001_vm0, %v3000_v0  ;;  %vm431_vm2 = vcmask 23552   ;;  %v423_v1 = vld [vmem:[#allocation8] sm:$0x7]  ;;  %v3223_v2 = vld [vmem:[#allocation7] sm:$0xf]  ;;  %s3458_s6 = sld [smem:[#allocation56_spill]] }
 0x15f   :  { %2214 = vmatprep.subr.mxu1 %v3000_v0  ;;  %2222 = vmatprep.mubr.msk.f32.mxu1 %vm3001_vm0, %v3000_v0  ;;  %v2048_v7 = vld [vmem:[#allocation10] ss:$0 sm:$0xff]  ;;  %vm521_vm3 = vcmask 261120   ;;  %s3459_s14 = sld [smem:[#allocation58_spill]]  ;;  %v2051_v16 = vld [vmem:[#allocation11] ss:$0 sm:$0xff] }
 0x160   :  { %2166 = vmatpush3.msk.msra.mxu0 %vm435_vm1, %v423_v1  ;;  %s3460_s10 = sld [smem:[#allocation59_spill]]  ;;  %v2053_v25 = vld [vmem:[#allocation13] ss:$0 sm:$0xff]  ;;  %v2055_v35 = vld [vmem:[#allocation14] ss:$0 sm:$0xff]  ;;  %vm1446_vm4 = vcmask 64512  }
 0x161   :  { %2168 = vmatmul.mubr.msk.f32.vlgmr.msra.gmra.mxu0 %vm431_vm2, %v3223_v2  ;;  %2170 = vmatprep.subr.mxu0 %v3000_v0  ;;  %s3461_s18 = sld [smem:[#allocation61_spill]]  ;;  %v937_v40 = vld [vmem:[#allocation19] sm:$0x7]  ;;  %v2057_v49 = vld [vmem:[#allocation16] ss:$0 sm:$0xff]  ;;  %vm1746_vm5 = vcmask 130048  }
 0x162   :  { %2178 = vmatprep.mubr.msk.f32.mxu0 %vm3001_vm0, %v3000_v0  ;;  %s3462_s22 = sld [smem:[#allocation63_spill]]  ;;  %v2061_v53 = vld [vmem:[#allocation20] ss:$0 sm:$0xff] }
 0x163   :  { %v513_v3 = vld [vmem:[%s3457_s30 + $0x18] sm:$0xff]  ;;  %v512_v4 = vld [vmem:[%s3457_s30 + $0x10] sm:$0xff]  ;;  %v511_v5 = vld [vmem:[%s3457_s30 + $0x8] sm:$0xff]  ;;  %s3463_s23 = sld [smem:[#allocation65_spill]] }
 0x164   :  { %2171 = vmatpush3.msra.mxu0 %v513_v3  ;;  %v510_v6 = vld [vmem:[%s3457_s30] sm:$0xff]  ;;  %v599_v12 = vld [vmem:[%s3458_s6 + $0x18] sm:$0xff]  ;;  %v598_v13 = vld [vmem:[%s3458_s6 + $0x10] sm:$0xff]  ;;  %s3464_s26 = sld [smem:[#allocation67_spill]] }
 0x165   :  { %2172 = vmatprep.subr.mxu0 %v3000_v0  ;;  %v597_v14 = vld [vmem:[%s3458_s6 + $0x8] sm:$0xff]  ;;  %v596_v15 = vld [vmem:[%s3458_s6] sm:$0xff]  ;;  %v685_v21 = vld [vmem:[%s3459_s14 + $0x18] sm:$0xff] }
 0x166   :  { %2173 = vmatpush3.msra.mxu0 %v512_v4  ;;  %v684_v22 = vld [vmem:[%s3459_s14 + $0x10] sm:$0xff]  ;;  %v683_v23 = vld [vmem:[%s3459_s14 + $0x8] sm:$0xff]  ;;  %v682_v24 = vld [vmem:[%s3459_s14] sm:$0xff] }
 0x167   :  { %2174 = vmatprep.subr.mxu0 %v3000_v0  ;;  %v770_v31 = vld [vmem:[%s3460_s10 + $0x18] sm:$0xff]  ;;  %v769_v32 = vld [vmem:[%s3460_s10 + $0x10] sm:$0xff]  ;;  %v768_v33 = vld [vmem:[%s3460_s10 + $0x8] sm:$0xff] }
 0x168   :  { %2175 = vmatpush3.msra.mxu0 %v511_v5  ;;  %v767_v34 = vld [vmem:[%s3460_s10] sm:$0xff]  ;;  %v856_v41 = vld [vmem:[%s3461_s18 + $0x18] sm:$0xff]  ;;  %v855_v42 = vld [vmem:[%s3461_s18 + $0x10] sm:$0xff] }
 0x169   :  { %2176 = vmatprep.subr.mxu0 %v3000_v0  ;;  %2215 = vmatpush3.msra.mxu1 %v856_v41  ;;  %v1022_v43 = vld [vmem:[%s3462_s22 + $0x18] sm:$0xff]  ;;  %v854_v44 = vld [vmem:[%s3461_s18 + $0x8] sm:$0xff]  ;;  %v1021_v45 = vld [vmem:[%s3462_s22 + $0x10] sm:$0xff] }
 0x16a   :  { %2177 = vmatpush3.msra.mxu0 %v510_v6  ;;  %2216 = vmatprep.subr.mxu1 %v3000_v0  ;;  %v853_v46 = vld [vmem:[%s3461_s18] sm:$0xff]  ;;  %v1020_v47 = vld [vmem:[%s3462_s22 + $0x8] sm:$0xff]  ;;  %v1107_v60 = vld [vmem:[%s3463_s23 + $0x18] sm:$0xff] }
 0x16b   :  { %2181 = vmatprep.subr.mxu0 %v3000_v0  ;;  %2217 = vmatpush3.msra.mxu1 %v855_v42  ;;  %v1019_v48 = vld [vmem:[%s3462_s22] sm:$0xff]  ;;  %v1106_v61 = vld [vmem:[%s3463_s23 + $0x10] sm:$0xff]  ;;  %v1105_v62 = vld [vmem:[%s3463_s23 + $0x8] sm:$0xff] }
 0x16c   :  { %2218 = vmatprep.subr.mxu1 %v3000_v0  ;;  %v1104_v63 = vld [vmem:[%s3463_s23] sm:$0xff]  ;;  %v1910_v41 = vld [vmem:[%s3177_s25 + $0x58] sm:$0xff]  ;;  %v1909_v42 = vld [vmem:[%s3177_s25 + $0x50] sm:$0xff] }
 0x16d   :  { %2219 = vmatpush3.msra.mxu1 %v854_v44  ;;  %v1907_v44 = vld [vmem:[%s3177_s25 + $0x40] sm:$0xff] }
 0x16e   :  { %2220 = vmatprep.subr.mxu1 %v3000_v0 }
 0x16f   :  { %2221 = vmatpush3.msra.mxu1 %v853_v46  ;;  %v1905_v46 = vld [vmem:[%s3177_s25 + $0x30] sm:$0xff] }
 0x170   :  { %2241 = vmatprep.subr.mxu1 %v3000_v0 }
 0x221   :  { %v505_v8 = vpop.f32.mrf.mxu0 }
 0x222   :  { %v506_v9 = vadd.f32 %v2048_v7, %v505_v8  ;;  %v1193_v8 = vld [vmem:[#allocation25 + $0x18] sm:$0xff] }
 0x223   :  { %v2169_v10 = vpop.f32.mrf.mxu0 }
 0x224   :  { %v509_v11 = vmax.f32 %v506_v9, 0.0  ;;  %v1192_v9 = vld [vmem:[#allocation25 + $0x10] sm:$0xff]  ;;  %v1191_v10 = vld [vmem:[#allocation25 + $0x8] sm:$0xff] }
 0x226   :  { %2179 = vmatmul.mubr.msk.f32.vlgmr.msra.gmra.mxu0 %vm521_vm3, %v509_v11 }
 0x227   :  { %2182 = vmatpush3.msra.mxu0 %v599_v12  ;;  %2189 = vmatprep.mubr.msk.f32.mxu0 %vm3001_vm0, %v3000_v0  ;;  %v1278_v12 = vld [vmem:[%s3464_s26 + $0x18] sm:$0xff] }
 0x228   :  { %2183 = vmatprep.subr.mxu0 %v3000_v0 }
 0x229   :  { %2184 = vmatpush3.msra.mxu0 %v598_v13  ;;  %v2066_v13 = vld [vmem:[#allocation23] ss:$0 sm:$0xff] }
 0x22a   :  { %2185 = vmatprep.subr.mxu0 %v3000_v0 }
 0x22b   :  { %2186 = vmatpush3.msra.mxu0 %v597_v14 }
 0x22c   :  { %2187 = vmatprep.subr.mxu0 %v3000_v0 }
 0x22d   :  { %2188 = vmatpush3.msra.mxu0 %v596_v15 }
 0x22e   :  { %2192 = vmatprep.subr.mxu0 %v3000_v0 }
 0x2e6   :  { %v591_v17 = vpop.f32.mrf.mxu0 }
 0x2e7   :  { %v592_v18 = vadd.f32 %v2051_v16, %v591_v17 }
 0x2e8   :  { %v2180_v19 = vpop.f32.mrf.mxu0 }
 0x2e9   :  { %v595_v20 = vmax.f32 %v592_v18, 0.0  ;;  %v1277_v19 = vld [vmem:[%s3464_s26 + $0x10] sm:$0xff] }
 0x2eb   :  { %2190 = vmatmul.mubr.msk.f32.vlgmr.msra.gmra.mxu0 %vm521_vm3, %v595_v20  ;;  %v1276_v20 = vld [vmem:[%s3464_s26 + $0x8] sm:$0xff] }
 0x2ec   :  { %2200 = vmatprep.mubr.msk.f32.mxu0 %vm3001_vm0, %v3000_v0  ;;  %2193 = vmatpush3.msra.mxu0 %v685_v21  ;;  %v1275_v21 = vld [vmem:[%s3464_s26] sm:$0xff] }
 0x2ed   :  { %2194 = vmatprep.subr.mxu0 %v3000_v0 }
 0x2ee   :  { %2195 = vmatpush3.msra.mxu0 %v684_v22  ;;  %v1364_v22 = vld [vmem:[#allocation29 + $0x18] sm:$0xff] }
 0x2ef   :  { %2196 = vmatprep.subr.mxu0 %v3000_v0 }
 0x2f0   :  { %2197 = vmatpush3.msra.mxu0 %v683_v23  ;;  %v2068_v23 = vld [vmem:[#allocation26] ss:$0 sm:$0xff] }
 0x2f1   :  { %2198 = vmatprep.subr.mxu0 %v3000_v0 }
 0x2f2   :  { %2199 = vmatpush3.msra.mxu0 %v682_v24 }
 0x2f3   :  { %2203 = vmatprep.subr.mxu0 %v3000_v0 }
 0x3ab   :  { %v676_v26 = vpop.f32.mrf.mxu0 }
 0x3ac   :  { %v677_v27 = vadd.f32 %v2053_v25, %v676_v26 }
 0x3ad   :  { %v2191_v28 = vpop.f32.mrf.mxu0 }
 0x3ae   :  { %v680_v29 = vadd.f32 %v677_v27, %v509_v11  ;;  %v1190_v11 = vld [vmem:[#allocation25] sm:$0xff] }
 0x3af   :  { %v1445_v28 = vld [vmem:[#allocation32] sm:$0xff] }
 0x3b0   :  { %v681_v30 = vmax.f32 %v680_v29, 0.0  ;;  %v2059_v29 = vld [vmem:[#allocation17] ss:$0 sm:$0xff] }
 0x3b2   :  { %2201 = vmatmul.mubr.msk.f32.vlgmr.msra.gmra.mxu0 %vm521_vm3, %v681_v30 }
 0x3b3   :  { %2204 = vmatpush3.msra.mxu0 %v770_v31  ;;  %2211 = vmatprep.mubr.msk.f32.mxu0 %vm3001_vm0, %v3000_v0  ;;  %v1745_v31 = vld [vmem:[#allocation34 + $0x8] sm:$0xff] }
 0x3b4   :  { %2205 = vmatprep.subr.mxu0 %v3000_v0 }
 0x3b5   :  { %2206 = vmatpush3.msra.mxu0 %v769_v32  ;;  %v1744_v32 = vld [vmem:[#allocation34] sm:$0xff] }
 0x3b6   :  { %2207 = vmatprep.subr.mxu0 %v3000_v0 }
 0x3b7   :  { %2208 = vmatpush3.msra.mxu0 %v768_v33  ;;  %v3342_v33 = vld [vmem:[#allocation2] sm:$0xf] }
 0x3b8   :  { %2209 = vmatprep.subr.mxu0 %v3000_v0 }
 0x3b9   :  { %2210 = vmatpush3.msra.mxu0 %v767_v34  ;;  %v1363_v34 = vld [vmem:[#allocation29 + $0x10] sm:$0xff] }
 0x3ba   :  { %2225 = vmatprep.subr.mxu0 %v3000_v0 }
 0x472   :  { %v762_v36 = vpop.f32.mrf.mxu0 }
 0x473   :  { %v763_v37 = vadd.f32 %v2055_v35, %v762_v36  ;;  %v1362_v35 = vld [vmem:[#allocation29 + $0x8] sm:$0xff]  ;;  %v1361_v36 = vld [vmem:[#allocation29] sm:$0xff] }
 0x474   :  { %v2202_v38 = vpop.f32.mrf.mxu0 }
 0x475   :  { %v766_v39 = vmax.f32 %v763_v37, 0.0  ;;  %v1914_v37 = vld [vmem:[%s3177_s25 + $0x78] sm:$0xff]  ;;  %v1913_v38 = vld [vmem:[%s3177_s25 + $0x70] sm:$0xff] }
 0x477   :  { %2212 = vmatmul.mubr.msk.f32.vlgmr.msra.gmra.mxu0 %vm521_vm3, %v766_v39  ;;  %v1912_v39 = vld [vmem:[%s3177_s25 + $0x68] sm:$0xff] }
 0x478   :  { %2226 = vmatpush3.msk.msra.mxu0 %vm435_vm1, %v937_v40  ;;  %2227 = vmatprep.mubr.msk.f32.mxu0 %vm3001_vm0, %v3000_v0  ;;  %v1911_v40 = vld [vmem:[%s3177_s25 + $0x60] sm:$0xff] }
 0x479   :  { %2230 = vmatprep.subr.mxu0 %v3000_v0 }
 0x47b   :  { %2228 = vmatmul.mubr.msk.f32.vlgmr.msra.gmra.mxu0 %vm431_vm2, %v3223_v2  ;;  %v2064_v2 = vld [vmem:[#allocation22] ss:$0 sm:$0xff] }
 0x47c   :  { %2238 = vmatprep.mubr.msk.f32.mxu0 %vm3001_vm0, %v3000_v0  ;;  %2231 = vmatpush3.msra.mxu0 %v1022_v43  ;;  %v1908_v43 = vld [vmem:[%s3177_s25 + $0x48] sm:$0xff] }
 0x47d   :  { %2232 = vmatprep.subr.mxu0 %v3000_v0 }
 0x47e   :  { %2233 = vmatpush3.msra.mxu0 %v1021_v45  ;;  %v1906_v45 = vld [vmem:[%s3177_s25 + $0x38] sm:$0xff] }
 0x47f   :  { %2234 = vmatprep.subr.mxu0 %v3000_v0 }
 0x480   :  { %2235 = vmatpush3.msra.mxu0 %v1020_v47  ;;  %v1904_v47 = vld [vmem:[%s3177_s25 + $0x28] sm:$0xff] }
 0x481   :  { %2236 = vmatprep.subr.mxu0 %v3000_v0 }
 0x482   :  { %2237 = vmatpush3.msra.mxu0 %v1019_v48  ;;  %v1903_v48 = vld [vmem:[%s3177_s25 + $0x20] sm:$0xff] }
 0x483   :  { %2252 = vmatprep.subr.mxu0 %v3000_v0 }
 0x537   :  { %v847_v50 = vpop.f32.mrf.mxu0 }
 0x538   :  { %v848_v51 = vadd.f32 %v2057_v49, %v847_v50  ;;  %v2070_v49 = vld [vmem:[#allocation28] ss:$0 sm:$0xff] }
 0x539   :  { %v2213_v52 = vpop.f32.mrf.mxu0 }
 0x53a   :  { %v851_v54 = vadd.f32 %v848_v51, %v681_v30 }
 0x53b   :  { %v1014_v55 = vpop.f32.mrf.mxu0 }
 0x53c   :  { %v852_v56 = vmax.f32 %v851_v54, 0.0  ;;  %v1015_v57 = vadd.f32 %v2061_v53, %v1014_v55 }
 0x53d   :  { %v2229_v58 = vpop.f32.mrf.mxu0 }
 0x53e   :  { %v1018_v59 = vmax.f32 %v1015_v57, 0.0  ;;  %2223 = vmatmul.mubr.msk.f32.vlgmr.msra.gmra.mxu1 %vm521_vm3, %v852_v56  ;;  %v1824_v56 = vld [vmem:[#allocation38] sm:$0xff]  ;;  %v1823_v58 = vld [vmem:[#allocation5] sm:$0xf] }
 0x53f   :  { %2249 = vmatprep.mubr.msk.f32.mxu1 %vm3001_vm0, %v3000_v0  ;;  %2242 = vmatpush3.msra.mxu1 %v1107_v60 }
 0x540   :  { %2239 = vmatmul.mubr.msk.f32.vlgmr.msra.gmra.mxu0 %vm521_vm3, %v1018_v59  ;;  %2243 = vmatprep.subr.mxu1 %v3000_v0 }
 0x541   :  { %2260 = vmatprep.mubr.msk.f32.mxu0 %vm3001_vm0, %v3000_v0  ;;  %2244 = vmatpush3.msra.mxu1 %v1106_v61  ;;  %v1902_v61 = vld [vmem:[%s3177_s25 + $0x18] sm:$0xff] }
 0x542   :  { %2245 = vmatprep.subr.mxu1 %v3000_v0  ;;  %2253 = vmatpush3.msra.mxu0 %v1193_v8 }
 0x543   :  { %2246 = vmatpush3.msra.mxu1 %v1105_v62  ;;  %2254 = vmatprep.subr.mxu0 %v3000_v0  ;;  %v1901_v62 = vld [vmem:[%s3177_s25 + $0x10] sm:$0xff] }
 0x544   :  { %2247 = vmatprep.subr.mxu1 %v3000_v0  ;;  %2255 = vmatpush3.msra.mxu0 %v1192_v9 }
 0x545   :  { %2248 = vmatpush3.msra.mxu1 %v1104_v63  ;;  %2256 = vmatprep.subr.mxu0 %v3000_v0  ;;  %v1900_v63 = vld [vmem:[%s3177_s25 + $0x8] sm:$0xff] }
 0x546   :  { %2263 = vmatprep.subr.mxu1 %v3000_v0  ;;  %2257 = vmatpush3.msra.mxu0 %v1191_v10 }
 0x547   :  { %2258 = vmatprep.subr.mxu0 %v3000_v0 }
 0x548   :  { %2259 = vmatpush3.msra.mxu0 %v1190_v11 }
 0x549   :  { %2274 = vmatprep.subr.mxu0 %v3000_v0 }
 0x5fe   :  { %v933_v1 = vpop.f32.mrf.mxu1 }
 0x5ff   :  { %v934_v30 = vadd.f32 %v2059_v29, %v933_v1  ;;  %v1899_v1 = vld [vmem:[%s3177_s25] sm:$0xff]  ;;  %s3008_s25 = smov [#allocation40]  }
 0x600   :  { %v2224_v3 = vpop.f32.mrf.mxu1  ;;  %v1099_v4 = vpop.f32.mrf.mxu0  ;;  %s1994_s20 = sshll.u32 %s3008_s25, 4  ;;  %s1995_s20 = int_to_ptr.vmem [resolvable:$true] %s1994_s20 }
 0x601   :  { %v1100_v5 = vadd.f32 %v2064_v2, %v1099_v4  ;;  %v2072_v2 = vld [vmem:[#allocation31] ss:$0 sm:$0xff]  ;;  %s2893_s28 = scalar_lea.vmem %s1995_s20, 64  ;;  %p2898_p9 = scmp.lt.s32.totalorder %s1995_s20, %s1995_s20 }
 0x602   :  { %v2240_v6 = vpop.f32.mrf.mxu0  ;;  %p2894_p8 = scmp.ne.s32.totalorder %s1995_s20, %s2893_s28  ;;  %p2899_p10 = scmp.lt.s32.totalorder %s2893_s28, %s2893_s28 }
 0x603   :  { %v1103_v7 = vmax.f32 %v1100_v5, 0.0 }
 0x604   :  { %p2900_p11 = por %p2899_p10, %p2898_p9 }
 0x605   :  { %2250 = vmatmul.mubr.msk.f32.vlgmr.msra.gmra.mxu1 %vm521_vm3, %v1103_v7 }
 0x606   :  { %2271 = vmatprep.mubr.msk.f32.mxu1 %vm3001_vm0, %v3000_v0  ;;  %2264 = vmatpush3.msra.mxu1 %v1278_v12  ;;  %p2901_p12 = pnand %p2900_p11, %p2894_p8 }
 0x607   :  { %2265 = vmatprep.subr.mxu1 %v3000_v0 }
 0x608   :  { %2266 = vmatpush3.msra.mxu1 %v1277_v19 }
 0x609   :  { %2267 = vmatprep.subr.mxu1 %v3000_v0 }
 0x60a   :  { %2268 = vmatpush3.msra.mxu1 %v1276_v20 }
 0x60b   :  { %2269 = vmatprep.subr.mxu1 %v3000_v0 }
 0x60c   :  { %2270 = vmatpush3.msra.mxu1 %v1275_v21  ;;  %v3004_v21 = vmov 2102212464  }
 0x60d   :  { %2285 = vmatprep.subr.mxu1 %v3000_v0 }
 0x6c5   :  { %v1184_v14 = vpop.f32.mrf.mxu1 }
 0x6c6   :  { %v1185_v15 = vadd.f32 %v2066_v13, %v1184_v14 }
 0x6c7   :  { %v2251_v16 = vpop.f32.mrf.mxu1 }
 0x6c8   :  { %v3320_v17 = vadd.f32 %v1185_v15, %v1018_v59  ;;  %v3002_v16 = vmov 920167782  }
 0x6ca   :  { %v1189_v18 = vmax.f32 %v3320_v17, 0.0  ;;  %v3003_v17 = vmov 1326507024  }
 0x6cc   :  { %2261 = vmatmul.mubr.msk.f32.vlgmr.msra.gmra.mxu0 %vm521_vm3, %v1189_v18 }
 0x6cd   :  { %2282 = vmatprep.mubr.msk.f32.mxu0 %vm3001_vm0, %v3000_v0  ;;  %2275 = vmatpush3.msra.mxu0 %v1364_v22 }
 0x6ce   :  { %2276 = vmatprep.subr.mxu0 %v3000_v0 }
 0x6cf   :  { %2277 = vmatpush3.msra.mxu0 %v1363_v34 }
 0x6d0   :  { %2278 = vmatprep.subr.mxu0 %v3000_v0 }
 0x6d1   :  { %2279 = vmatpush3.msra.mxu0 %v1362_v35 }
 0x6d2   :  { %2280 = vmatprep.subr.mxu0 %v3000_v0 }
 0x6d3   :  { %2281 = vmatpush3.msra.mxu0 %v1361_v36 }
 0x6d4   :  { %2297 = vmatprep.subr.mxu0 %v3000_v0 }
 0x78c   :  { %v1270_v24 = vpop.f32.mrf.mxu0 }
 0x78d   :  { %v1271_v25 = vadd.f32 %v2068_v23, %v1270_v24  ;;  %v3005_v23 = vmov 2475754826  }
 0x78e   :  { %v2262_v26 = vpop.f32.mrf.mxu0 }
 0x78f   :  { %v1274_v27 = vmax.f32 %v1271_v25, 0.0  ;;  %v3006_v25 = vmov 2131351028  }
 0x791   :  { %2272 = vmatmul.mubr.msk.f32.vlgmr.msra.gmra.mxu1 %vm521_vm3, %v1274_v27 }
 0x792   :  { %2286 = vmatpush3.msra.mxu1 %v1445_v28  ;;  %2287 = vmatprep.mubr.msk.f32.mxu1 %vm3001_vm0, %v3000_v0 }
 0x793   :  { %2290 = vmatprep.subr.mxu1 %v3000_v0 }
 0x795   :  { %2288 = vmatmul.mubr.msk.f32.vlgmr.msra.gmra.mxu1 %vm1446_vm4, %v934_v30  ;;  %v3007_v30 = vmov 683565275  }
 0x796   :  { %2291 = vmatpush3.msra.mxu1 %v1745_v31  ;;  %2294 = vmatprep.mubr.msk.f32.mxu1 %vm3001_vm0, %v3000_v0 }
 0x797   :  { %2292 = vmatprep.subr.mxu1 %v3000_v0 }
 0x798   :  { %2293 = vmatpush3.msra.mxu1 %v1744_v32 }
 0x799   :  { %2295 = vmatmul.mubr.msk.f32.vlgmr.msra.gmra.mxu1 %vm1746_vm5, %v3342_v33  ;;  %2302 = vmatprep.subr.mxu1 %v3000_v0 }
 0x79a   :  { %2334 = vmatprep.mubr.msk.f32.mxu1 %vm3001_vm0, %v3000_v0  ;;  %2303 = vmatpush3.msra.mxu1 %v1914_v37 }
 0x79b   :  { %2304 = vmatprep.subr.mxu1 %v3000_v0 }
 0x79c   :  { %2305 = vmatpush3.msra.mxu1 %v1913_v38 }
 0x79d   :  { %2306 = vmatprep.subr.mxu1 %v3000_v0 }
 0x79e   :  { %2307 = vmatpush3.msra.mxu1 %v1912_v39 }
 0x79f   :  { %2308 = vmatprep.subr.mxu1 %v3000_v0 }
 0x7a0   :  { %2309 = vmatpush3.msra.mxu1 %v1911_v40 }
 0x7a1   :  { %2310 = vmatprep.subr.mxu1 %v3000_v0 }
 0x7a2   :  { %2311 = vmatpush3.msra.mxu1 %v1910_v41 }
 0x7a3   :  { %2312 = vmatprep.subr.mxu1 %v3000_v0 }
 0x7a4   :  { %2313 = vmatpush3.msra.mxu1 %v1909_v42 }
 0x7a5   :  { %2314 = vmatprep.subr.mxu1 %v3000_v0 }
 0x7a6   :  { %2315 = vmatpush3.msra.mxu1 %v1908_v43 }
 0x7a7   :  { %2316 = vmatprep.subr.mxu1 %v3000_v0 }
 0x7a8   :  { %2317 = vmatpush3.msra.mxu1 %v1907_v44 }
 0x7a9   :  { %2318 = vmatprep.subr.mxu1 %v3000_v0 }
 0x7aa   :  { %2319 = vmatpush3.msra.mxu1 %v1906_v45 }
 0x7ab   :  { %2320 = vmatprep.subr.mxu1 %v3000_v0 }
 0x7ac   :  { %2321 = vmatpush3.msra.mxu1 %v1905_v46 }
 0x7ad   :  { %2322 = vmatprep.subr.mxu1 %v3000_v0 }
 0x7ae   :  { %2323 = vmatpush3.msra.mxu1 %v1904_v47 }
 0x7af   :  { %2324 = vmatprep.subr.mxu1 %v3000_v0 }
 0x7b0   :  { %2325 = vmatpush3.msra.mxu1 %v1903_v48 }
 0x7b1   :  { %2326 = vmatprep.subr.mxu1 %v3000_v0 }
 0x7b2   :  { %2327 = vmatpush3.msra.mxu1 %v1902_v61 }
 0x7b3   :  { %2328 = vmatprep.subr.mxu1 %v3000_v0 }
 0x7b4   :  { %2329 = vmatpush3.msra.mxu1 %v1901_v62 }
 0x7b5   :  { %2330 = vmatprep.subr.mxu1 %v3000_v0 }
 0x7b6   :  { %2331 = vmatpush3.msra.mxu1 %v1900_v63 }
 0x7b7   :  { %2332 = vmatprep.subr.mxu1 %v3000_v0 }
 0x7b8   :  { %2333 = vmatpush3.msra.mxu1 %v1899_v1 }
 0x851   :  { %v1355_v50 = vpop.f32.mrf.mxu1 }
 0x852   :  { %v1356_v51 = vadd.f32 %v2070_v49, %v1355_v50 }
 0x853   :  { %v2273_v52 = vpop.f32.mrf.mxu1 }
 0x854   :  { %v1359_v53 = vadd.f32 %v1356_v51, %v1189_v18 }
 0x855   :  { %v3378_v54 = vpop.f32.mrf.mxu1 }
 0x856   :  { %v1360_v55 = vmax.f32 %v1359_v53, 0.0  ;;  %v1523_v9 = vand.u32 2139095040, %v3378_v54  ;;  %v1520_v19 = vand.u32 2147483647, %v3378_v54  ;;  %vm1522_vm13 = vcmp.lt.s32.totalorder %v3378_v54, 0 }
 0x857   :  { %v2289_v57 = vpop.f32.mrf.mxu1  ;;  %vm1612_vm5 = vweird.f32 %v3378_v54 }
 0x858   :  { %2283 = vmatmul.mubr.msk.f32.vlgmr.msra.gmra.mxu0 %vm521_vm3, %v1360_v55  ;;  %v1524_v10 = vshrl.u32 %v1523_v9, 23  ;;  %v1527_v36 = vand.u32 8388607, %v1520_v19  ;;  %vm1521_vm14 = vcmp.le.f32.partialorder %v1520_v19, 0.7853982 }
 0x859   :  { %2298 = vmatpush3.msra.mxu0 %v1824_v56  ;;  %2299 = vmatprep.mubr.msk.f32.mxu0 %vm3001_vm0, %v3000_v0  ;;  %v3383_v59 = vpop.f32.mrf.mxu1 }
 0x85a   :  { %v2075_v11 = vadd.s32 4294967169, %v1524_v10  ;;  %v1528_v42 = vor.u32 8388608, %v1527_v36 }
 0x85b   :  { %v2296_v60 = vpop.f32.mrf.mxu1 }
 0x85c   :  { %2300 = vmatmul.mubr.msk.f32.vlgmr.msra.gmra.mxu0 %vm1446_vm4, %v1823_v58  ;;  %v1530_v12 = vadd.s32 1, %v2075_v11  ;;  %v1568_v49 = vshll.u32 %v1528_v42, 8 }
 0x85e   :  { %vm1531_vm6 = vcmp.gt.s32.totalorder %v1530_v12, 0 }
 0x85f   :  { %v1532_v13 = vsel %vm1531_vm6, %v1530_v12, 0  ;;  %vm1986_vm6 = vcmask 125952  }
 0x860   :  { %v1534_v14 = vand.u32 31, %v1532_v13  ;;  %v1533_v20 = vshrl.u32 %v1532_v13, 5 }
 0x862   :  { %v1535_v15 = vsub.s32 32, %v1534_v14  ;;  %v1546_v22 = vshll.u32 %v3004_v21, %v1534_v14  ;;  %v1549_v28 = vshll.u32 %v3002_v16, %v1534_v14  ;;  %v1537_v31 = vshll.u32 %v3007_v30, %v1534_v14 }
 0x863   :  { %v1540_v32 = vshll.u32 %v3005_v23, %v1534_v14  ;;  %v1543_v34 = vshll.u32 %v3006_v25, %v1534_v14  ;;  %vm1555_vm7 = vcmp.lt.s32.totalorder %v1533_v20, 4  ;;  %vm1552_vm8 = vcmp.lt.s32.totalorder %v1533_v20, 1 }
 0x864   :  { %v1547_v0 = vshrl.u32 %v3002_v16, %v1535_v15  ;;  %v1550_v18 = vshrl.u32 %v3003_v17, %v1535_v15  ;;  %v1538_v24 = vshrl.u32 %v3005_v23, %v1535_v15  ;;  %v1541_v26 = vshrl.u32 %v3006_v25, %v1535_v15 }
 0x865   :  { %v1544_v27 = vshrl.u32 %v3004_v21, %v1535_v15  ;;  %vm1554_vm9 = vcmp.lt.s32.totalorder %v1533_v20, 3  ;;  %vm1553_vm10 = vcmp.lt.s32.totalorder %v1533_v20, 2  ;;  %v1536_v56 = vshrl.u32 %v3007_v30, %v1535_v15 }
 0x866   :  { %v1548_v29 = vor.u32 %v1547_v0, %v1546_v22  ;;  %v1551_v35 = vor.u32 %v1550_v18, %v1549_v28  ;;  %v1539_v37 = vor.u32 %v1538_v24, %v1537_v31  ;;  %v1542_v38 = vor.u32 %v1541_v26, %v1540_v32 }
 0x867   :  { %v1545_v39 = vor.u32 %v1544_v27, %v1543_v34 }
 0x868   :  { %v1561_v40 = vsel %vm1555_vm7, %v1548_v29, 920167782  ;;  %v1565_v41 = vsel %vm1555_vm7, %v1551_v35, 1326507024  ;;  %v1560_v43 = vsel %vm1552_vm8, %v1539_v37, %v1542_v38  ;;  %v1556_v57 = vsel %vm1552_vm8, %v1536_v56, %v1539_v37 }
 0x869   :  { %v1562_v44 = vsel %vm1554_vm9, %v1545_v39, %v1561_v40  ;;  %v1564_v45 = vsel %vm1552_vm8, %v1542_v38, %v1545_v39  ;;  %v1566_v46 = vsel %vm1554_vm9, %v1548_v29, %v1565_v41  ;;  %v1557_v55 = vsel %vm1555_vm7, %v1545_v39, 2102212464 }
 0x86a   :  { %v1563_v47 = vsel %vm1553_vm10, %v1560_v43, %v1562_v44  ;;  %v1567_v48 = vsel %vm1553_vm10, %v1564_v45, %v1566_v46  ;;  %v1558_v58 = vsel %vm1554_vm9, %v1542_v38, %v1557_v55  ;;  %v2084_v44 = vld [vmem:[#allocation35] ss:$0 sm:$0xff]  ;;  %v2079_v45 = vld [vmem:[#allocation37] ss:$0 sm:$0xff] }
 0x86b   :  { %v3403_v50 = vmul.u32.u64.low %v1568_v49, %v1563_v47  ;;  %v3404_v51 = vmul.u32.u64.high %v1568_v49, %v1563_v47, %v3403_v50  ;;  %v3406_v52 = vmul.u32.u64.low %v1568_v49, %v1567_v48  ;;  %v3407_v53 = vmul.u32.u64.high %v1568_v49, %v1567_v48, %v3406_v52 }
 0x86c   :  { %v1559_v61 = vsel %vm1553_vm10, %v1556_v57, %v1558_v58 }
 0x86d   :  { %v1578_v60 = vadd.s32 1, %v3404_v51  ;;  %vm1577_vm11 = vc.u32 %v3407_v53, %v3403_v50  ;;  %v1575_v63 = vmul.u32 %v1568_v49, %v1559_v61  ;;  %v1576_v14 = vadd.s32 %v3403_v50, %v3407_v53 }
 0x86f   :  { %v1579_v62 = vsel %vm1577_vm11, %v1578_v60, %v3404_v51 }
 0x870   :  { %v1580_v1 = vadd.s32 %v1579_v62, %v1575_v63 }
 0x918   :  { %v1441_v3 = vpop.f32.mrf.mxu0 }
 0x919   :  { %v1442_v5 = vadd.f32 %v2072_v2, %v1441_v3  ;;  %v1581_v2 = vadd.s32 536870912, %v1580_v1 }
 0x91a   :  { %v2284_v4 = vpop.f32.mrf.mxu0 }
 0x91b   :  { %v1582_v3 = vshrl.u32 %v1581_v2, 30 }
 0x91c   :  { %v1894_v6 = vpop.f32.mrf.mxu0 }
 0x91d   :  { %v1898_v7 = vmul.f32 %v1894_v6, %v1442_v5  ;;  %v1583_v4 = vshll.u32 %v1582_v3, 30  ;;  %v1606_v26 = vsub.s32 4, %v1582_v3 }
 0x91e   :  { %v2301_v8 = vpop.f32.mrf.mxu0 }
 0x91f   :  { %2335 = vmatmul.mubr.f32.vlgmr.msra.gmra.mxu1 %v1898_v7  ;;  %v1584_v5 = vsub.s32 %v1580_v1, %v1583_v4  ;;  %v1607_v27 = vsel %vm1522_vm13, %v1606_v26, %v1582_v3 }
 0x920   :  { %v1609_v28 = vsel %vm1521_vm14, 0, %v1607_v27 }
 0x921   :  { %v1586_v6 = vsub.s32 0, %v1584_v5  ;;  %v1724_v29 = vadd.s32 3, %v1609_v28  ;;  %v1613_v32 = vand.u32 3, %v1609_v28 }
 0x923   :  { %v2076_v7 = vmin.u32 %v1586_v6, %v1584_v5  ;;  %v1725_v34 = vand.u32 3, %v1724_v29  ;;  %vm1615_vm15 = vcmp.eq.s32.totalorder %v1613_v32, 0  ;;  %vm1618_vm0 = vcmp.eq.s32.totalorder %v1613_v32, 2 }
 0x924   :  { %vm1614_vm3 = vcmp.lt.s32.totalorder %v1613_v32, 2 }
 0x925   :  { %v1588_v8 = vclz %v2076_v7  ;;  %vm1727_vm1 = vcmp.eq.s32.totalorder %v1725_v34, 0  ;;  %vm1730_vm2 = vcmp.eq.s32.totalorder %v1725_v34, 2  ;;  %vm1726_vm4 = vcmp.lt.s32.totalorder %v1725_v34, 2 }
 0x927   :  { %v2077_v9 = vadd.s32 4294967294, %v1588_v8 }
 0x929   :  { %vm2078_vm12 = vcmp.lt.s32.totalorder %v2077_v9, 0 }
 0x92a   :  { %v1591_v10 = vsel %vm2078_vm12, 0, %v2077_v9 }
 0x92b   :  { %v1596_v11 = vsub.s32 4294967266, %v1591_v10  ;;  %v1592_v13 = vsub.s32 32, %v1591_v10  ;;  %v1593_v0 = vshll.u32 %v1584_v5, %v1591_v10 }
 0x92d   :  { %v1597_v12 = vadd.s32 127, %v1596_v11  ;;  %v1594_v16 = vshrl.u32 %v1576_v14, %v1592_v13 }
 0x92f   :  { %v1598_v15 = vshll.u32 %v1597_v12, 23  ;;  %v1595_v18 = vor.u32 %v1594_v16, %v1593_v0 }
 0x931   :  { %v1599_v17 = vor.u32 4788187, %v1598_v15  ;;  %v1602_v21 = vcvt.s32.f32 %v1595_v18 }
 0x933   :  { %v1600_v20 = vand.u32 2147483647, %v1599_v17 }
 0x935   :  { %v1603_v22 = vmul.f32 %v1602_v21, %v1600_v20 }
 0x937   :  { %v1604_v23 = vxor.u32 2147483648, %v1603_v22 }
 0x939   :  { %v1605_v24 = vsel %vm1522_vm13, %v1604_v23, %v1603_v22 }
 0x93a   :  { %v1608_v25 = vsel %vm1521_vm14, %v3378_v54, %v1605_v24 }
 0x93b   :  { %2409 = vcosq.f32 %v1608_v25 }
 0x93c   :  { %2411 = vsinq.f32 %v1608_v25 }
 0x948   :  { %v2410_v30 = vpop.eup %2409 }
 0x949   :  { %v2412_v31 = vpop.eup %2411  ;;  %v1619_v36 = vxor.u32 2147483648, %v2410_v30 }
 0x94a   :  { %v1616_v35 = vxor.u32 2147483648, %v2412_v31 }
 0x94b   :  { %v1620_v19 = vsel %vm1618_vm0, %v1619_v36, %v2412_v31  ;;  %v1732_v39 = vsel %vm1730_vm2, %v1619_v36, %v2412_v31 }
 0x94c   :  { %v1617_v37 = vsel %vm1615_vm15, %v2410_v30, %v1616_v35  ;;  %v1729_v38 = vsel %vm1727_vm1, %v2410_v30, %v1616_v35 }
 0x94d   :  { %v1621_v40 = vsel %vm1614_vm3, %v1617_v37, %v1620_v19  ;;  %v1733_v41 = vsel %vm1726_vm4, %v1729_v38, %v1732_v39 }
 0x94e   :  { %v1622_v42 = vsel %vm1612_vm5, nan, %v1621_v40  ;;  %v1734_v43 = vsel %vm1612_vm5, nan, %v1733_v41 }
 0x94f   :  { %v1742_v46 = vmul.f32 %v2084_v44, %v1734_v43  ;;  %v1630_v47 = vmul.f32 %v2079_v45, %v1622_v42 }
 0x951   :  { %v1821_v48 = vmul.f32 %v3383_v59, %v1742_v46  ;;  %v1820_v49 = vmul.f32 %v3342_v33, %v1630_v47 }
 0x953   :  { %v1822_v50 = vadd.f32 %v1821_v48, %v1820_v49 }
 0x9df   :  { %v1981_v51 = vpop.f32.mrf.mxu1 }
 0x9e0   :  { %v1985_v52 = vadd.f32 %v1981_v51, %v1822_v50 }
 0x9e1   :  { %v2336_v53 = vpop.f32.mrf.mxu1 }
 0x9e2   :  { %1987 = vst.msk [vmem:[#allocation40] sm:$0xf] %vm1986_vm6, %v1985_v52 }
 0x9e3   :  { %2904 = shalt.err (!%p2901_p12)
}
 0x9e4   :  { %1997 = dma.vmem_to_hbm [thread:$0]  %s1995_s20, 64, %s3182_s8, [#allocation4]  }
 0x9e5   :  { %2939 = dma.done.wait [#allocation4], 64  }
 0x9e6   :  { %2940 = vsyncadd [#allocation4], 4294967232 }
 0x9e7   :  { %2001 = vsyncpa [#allocation3], 1 }
 0x9e8   :  { %2002 = vsyncpa [#allocation6], 1 }
 0x9e9   :  { %2003 = vsyncpa [#allocation9], 1 }
 0x9ea   :  { %2004 = vsyncpa [#allocation12], 1 }
 0x9eb   :  { %2005 = vsyncpa [#allocation15], 1 }
 0x9ec   :  { %2006 = vsyncpa [#allocation18], 1 }
 0x9ed   :  { %2007 = vsyncpa [#allocation21], 1 }
 0x9ee   :  { %2008 = vsyncpa [#allocation24], 1 }
 0x9ef   :  { %2009 = vsyncpa [#allocation27], 1 }
 0x9f0   :  { %2010 = vsyncpa [#allocation30], 1 }
 0x9f1   :  { %2011 = vsyncpa [#allocation33], 1 }
 0x9f2   :  { %2012 = vsyncpa [#allocation36], 1 }
 0x9f3   :  { %2013 = vsyncpa [#allocation39], 1 }
 0x9f4   :  { %2014 = vsyncpa [#allocation4], 1 }

</bundles_post_ra>
